<compile_context>
chip_gen: v6e
topology: v6e:2x2x1
jax: 0.10.0
libtpu: 0.0.40
codegen_flags: <defaults>
</compile_context>

<pallas_src>
import jax
import jax.numpy as jnp
from jax import lax
from jax.experimental import pallas as pl
from jax.experimental.pallas import tpu as pltpu


def _sknet_kernel(x_ref, w3_ref, b3_ref, w5_ref, b5_ref,
                  wfc_ref, bfc_ref, A_ref, B_ref, o_ref):
    Nb, H, WCout = o_ref.shape
    Cout = A_ref.shape[1]
    W = WCout // Cout
    inv_hw = 1.0 / (H * W)

    b3 = b3_ref[...]          # (1, W*Cout)  bias tiled across W
    b5 = b5_ref[...]
    wfc = wfc_ref[...]        # (Z, Cout)
    bfc = bfc_ref[...]        # (Z, 1)
    A = A_ref[...]            # (Z, Cout)
    Bm = B_ref[...]           # (Z, Cout)

    for n in range(Nb):                       # static per-image loop
        x_img = x_ref[n]                      # (Hp, Wp*Cin) f32, lane-dense

        # Both convs as 3 banded matmuls each: row-shifted slices of the
        # padded image against (Wp*Cin, W*Cout) weight matrices.
        y3 = jnp.zeros((H, WCout), jnp.float32)
        y5 = jnp.zeros((H, WCout), jnp.float32)
        for kh in range(3):
            a3 = x_img[1 + kh:1 + kh + H, :].astype(jnp.bfloat16)
            y3 = y3 + jnp.dot(a3, w3_ref[kh],
                              preferred_element_type=jnp.float32)
            a5 = x_img[2 * kh:2 * kh + H, :].astype(jnp.bfloat16)
            y5 = y5 + jnp.dot(a5, w5_ref[kh],
                              preferred_element_type=jnp.float32)

        x3 = jnp.maximum(y3 + b3, 0.0)        # conv + folded BN + ReLU
        x5 = jnp.maximum(y5 + b5, 0.0)

        # Global average pool over (H, W) per channel in the lane-dense layout
        fuse = x3 + x5
        col = jnp.sum(fuse, axis=0, keepdims=True)           # (1, W*Cout)
        pooled = col[:, 0:Cout]
        for w in range(1, W):
            pooled = pooled + col[:, w * Cout:(w + 1) * Cout]
        pooled = pooled * inv_hw                             # (1, Cout)

        # fc + ReLU and the 2-way selection gate: tiny, exact f32 VPU ops.
        z = jnp.maximum(
            jnp.sum(wfc * pooled, axis=1, keepdims=True) + bfc, 0.0)  # (Z, 1)
        ga = jnp.sum(z * A, axis=0, keepdims=True)           # (1, Cout)
        gb = jnp.sum(z * Bm, axis=0, keepdims=True)          # (1, Cout)
        # s1 = exp(ga)/(exp(ga)+exp(gb)) == sigmoid(ga-gb), overflow-safe form
        s1 = pl.reciprocal(1.0 + jnp.exp(gb - ga))           # (1, Cout)
        s1_t = jnp.concatenate([s1] * W, axis=1)             # (1, W*Cout)

        o_ref[n] = x5 + (x3 - x5) * s1_t                     # gated recombine


def _banded_weights(w_folded, W, dil, base_off):
    """Fold the spatial W axis of a 3x3 conv into the matmul contraction.

    Returns (3, Wp*Cin, W*Cout) bf16: one banded matrix per kernel row kh so
    that conv output row h is  sum_kh  xpad[row_off(kh)+h, :] @ M[kh]  with the
    padded input laid out as (Hp, Wp*Cin) and the output as (H, W*Cout).
    """
    _, _, Cin, Cout = w_folded.shape
    Wp = W + 4
    w_idx = jnp.arange(W)
    mats = []
    for kh in range(3):
        M = jnp.zeros((Wp, W, Cin, Cout), jnp.float32)
        for kw in range(3):
            col = base_off + dil * kw + w_idx                 # padded column idx
            M = M.at[col, w_idx, :, :].add(w_folded[kh, kw][None])
        mats.append(jnp.transpose(M, (0, 2, 1, 3)).reshape(Wp * Cin, W * Cout))
    return jnp.stack(mats, axis=0).astype(jnp.bfloat16)


def init_params(key, in_ch, out_ch, reduction=16):
    Z = max(out_ch // reduction, 32)
    ks = jax.random.split(key, 16)

    def u(k, shape, lo=0.0, hi=1.0):
        return jax.random.uniform(k, shape, jnp.float32, lo, hi)

    # conv_3 (3x3, dilation=1) raw params + BN stats
    w3 = u(ks[0], (3, 3, in_ch, out_ch), -0.5, 0.5)
    cb3 = u(ks[1], (out_ch,), -0.1, 0.1)
    g3, be3 = u(ks[2], (out_ch,), 0.5, 1.5), u(ks[3], (out_ch,), -0.1, 0.1)
    m3, v3 = u(ks[4], (out_ch,), -0.1, 0.1), u(ks[5], (out_ch,), 0.5, 1.5)
    # conv_5 (3x3, dilation=2) raw params + BN stats
    w5 = u(ks[6], (3, 3, in_ch, out_ch), -0.5, 0.5)
    cb5 = u(ks[7], (out_ch,), -0.1, 0.1)
    g5, be5 = u(ks[8], (out_ch,), 0.5, 1.5), u(ks[9], (out_ch,), -0.1, 0.1)
    m5, v5 = u(ks[10], (out_ch,), -0.1, 0.1), u(ks[11], (out_ch,), 0.5, 1.5)
    # fc: torch Linear(out_ch, Z) weight in its native (Z, out_ch) orientation
    wfc = u(ks[12], (Z, out_ch), -0.3, 0.3)
    bfc = u(ks[13], (Z,), -0.1, 0.1)
    # selection matrices A, B: (Z, out_ch), torch.rand -> uniform [0,1)
    A = u(ks[14], (Z, out_ch))
    B = u(ks[15], (Z, out_ch))

    def fold(w, cb, g, be, m, v, eps=1e-5):
        scale = g / jnp.sqrt(v + eps)
        wf = w * scale                                   # (3, 3, Cin, Cout)
        bf = (cb - m) * scale + be
        return wf, bf.reshape(1, out_ch)

    w3f, b3f = fold(w3, cb3, g3, be3, m3, v3)
    w5f, b5f = fold(w5, cb5, g5, be5, m5, v5)
    return dict(w3=w3f, b3=b3f, w5=w5f, b5=b5f, wfc=wfc, bfc=bfc, A=A, B=B)


def prepare_kernel_params(params, spatial_w):
    """One-time setup: banded bf16 conv matrices + lane-tiled biases."""
    W = spatial_w
    Z = params["wfc"].shape[0]
    return dict(
        w3b=_banded_weights(params["w3"], W, dil=1, base_off=1),
        b3t=jnp.tile(params["b3"], (1, W)),
        w5b=_banded_weights(params["w5"], W, dil=2, base_off=0),
        b5t=jnp.tile(params["b5"], (1, W)),
        wfc=params["wfc"],
        bfc_col=params["bfc"].reshape(Z, 1),
        A=params["A"], B=params["B"])


def _pick_batch_block(B, per_image_bytes, budget_bytes=8 * 1024 * 1024):
    """Largest Nb dividing B that fits the VMEM budget and keeps >= 2 grid
    steps (so both v7x TensorCores get work) whenever B >= 2."""
    best = 1
    for nb in range(1, B + 1):
        if B % nb != 0:
            continue
        if nb * per_image_bytes > budget_bytes:
            continue
        if B >= 2 and B // nb < 2:
            continue
        best = nb
    return best


@jax.jit
def conv_sknet_forward(x_nchw, kp):
    x = jnp.transpose(x_nchw, (0, 2, 3, 1)).astype(jnp.float32)   # NCHW -> NHWC
    B, H, W, Cin = x.shape
    Hp, Wp = H + 4, W + 4
    WpC = Wp * Cin

    xpad = jnp.pad(x, ((0, 0), (2, 2), (2, 2), (0, 0)))
    x2 = xpad.reshape(B, Hp, WpC)                                 # lane-dense input

    Z, Cout = kp["A"].shape
    WCout = kp["b3t"].shape[1]
    assert WCout == W * Cout, "params were prepared for a different width"

    per_image = (Hp * WpC + H * WCout) * 4 * 2        # f32, double-buffered I/O
    Nb = _pick_batch_block(B, per_image)
    grid = (B // Nb,)

    grid_spec = pltpu.PrefetchScalarGridSpec(
        num_scalar_prefetch=0,
        grid=grid,
        in_specs=[
            pl.BlockSpec((Nb, Hp, WpC), lambda n: (n, 0, 0)),      # x (lane-dense)
            pl.BlockSpec((3, WpC, WCout), lambda n: (0, 0, 0)),    # banded w3 (bf16)
            pl.BlockSpec((1, WCout), lambda n: (0, 0)),            # b3 tiled
            pl.BlockSpec((3, WpC, WCout), lambda n: (0, 0, 0)),    # banded w5 (bf16)
            pl.BlockSpec((1, WCout), lambda n: (0, 0)),            # b5 tiled
            pl.BlockSpec((Z, Cout), lambda n: (0, 0)),             # fc weight
            pl.BlockSpec((Z, 1), lambda n: (0, 0)),                # fc bias
            pl.BlockSpec((Z, Cout), lambda n: (0, 0)),             # A
            pl.BlockSpec((Z, Cout), lambda n: (0, 0)),             # B
        ],
        out_specs=pl.BlockSpec((Nb, H, WCout), lambda n: (n, 0, 0)),
    )

    out = pl.pallas_call(
        _sknet_kernel,
        out_shape=jax.ShapeDtypeStruct((B, H, WCout), jnp.float32),
        grid_spec=grid_spec,
        compiler_params=pltpu.CompilerParams(
            dimension_semantics=("parallel",),
            vmem_limit_bytes=32 * 1024 * 1024),
    )(x2, kp["w3b"], kp["b3t"], kp["w5b"], kp["b5t"],
      kp["wfc"], kp["bfc_col"], kp["A"], kp["B"])

    out = out.reshape(B, H, W, Cout)                   # lane-dense -> NHWC
    return jnp.transpose(out, (0, 3, 1, 2))            # NHWC -> NCHW


def reference_forward(x_nchw, params):
    """Pure-JAX reference with matching operand precision (bf16 conv operands,
    f32 accumulation / elementwise) for correctness checking."""
    x = jnp.transpose(x_nchw, (0, 2, 3, 1)).astype(jnp.float32)
    xb = x.astype(jnp.bfloat16)

    def conv_bn_relu(w, b, dil, pad):
        y = lax.conv_general_dilated(
            xb, w.astype(jnp.bfloat16), window_strides=(1, 1),
            padding=((pad, pad), (pad, pad)), rhs_dilation=(dil, dil),
            dimension_numbers=("NHWC", "HWIO", "NHWC"),
            preferred_element_type=jnp.float32)
        return jnp.maximum(y + b.reshape(1, 1, 1, -1), 0.0)

    x3 = conv_bn_relu(params["w3"], params["b3"], 1, 1)
    x5 = conv_bn_relu(params["w5"], params["b5"], 2, 2)
    fuse = x3 + x5
    pooled = jnp.mean(fuse, axis=(1, 2))                           # (B, Cout)
    hi = lax.Precision.HIGHEST
    z = jnp.maximum(jnp.dot(pooled, params["wfc"].T, precision=hi)
                    + params["bfc"][None, :], 0.0)                 # (B, Z)
    a = jnp.dot(z, params["A"], precision=hi)
    b = jnp.dot(z, params["B"], precision=hi)
    s1 = (jnp.exp(a) / (jnp.exp(a) + jnp.exp(b)))[:, None, None, :]
    V = x3 * s1 + x5 * (1.0 - s1)
    return jnp.transpose(V, (0, 3, 1, 2))


if __name__ == "__main__":
    key = jax.random.PRNGKey(0)
    k_x, k_p = jax.random.split(key)

    batch, in_ch, out_ch, spatial = 2, 4, 32, 16
    x = jax.random.normal(k_x, (batch, in_ch, spatial, spatial), jnp.float32)
    params = init_params(k_p, in_ch, out_ch, reduction=16)
    kparams = prepare_kernel_params(params, spatial)

    out = conv_sknet_forward(x, kparams)
    out = jax.block_until_ready(out)

    ref = reference_forward(x, params)
    assert out.shape == (batch, out_ch, spatial, spatial), out.shape
    max_err = float(jnp.max(jnp.abs(out - ref)))
    assert jnp.allclose(out, ref, rtol=2e-3, atol=2e-3), max_err

    print("KERNEL_OK")
</pallas_src>

<mosaic_0001>
module attributes {stable_mosaic.version = 11 : i64} {
  func.func @_sknet_kernel(%arg0: i32, %arg1: memref<1x20x80xf32, #tpu.memory_space<vmem>>, %arg2: memref<3x80x512xbf16, #tpu.memory_space<vmem>>, %arg3: memref<1x512xf32, #tpu.memory_space<vmem>>, %arg4: memref<3x80x512xbf16, #tpu.memory_space<vmem>>, %arg5: memref<1x512xf32, #tpu.memory_space<vmem>>, %arg6: memref<32x32xf32, #tpu.memory_space<vmem>>, %arg7: memref<32x1xf32, #tpu.memory_space<vmem>>, %arg8: memref<32x32xf32, #tpu.memory_space<vmem>>, %arg9: memref<32x32xf32, #tpu.memory_space<vmem>>, %arg10: memref<1x16x512xf32, #tpu.memory_space<vmem>>) attributes {dimension_semantics = [#tpu.dimension_semantics<parallel>], iteration_bounds = array<i64: 2>, scalar_prefetch = 0 : i64, scratch_operands = 0 : i64, tpu.core_type = #tpu.core_type<tc>, window_params = [{transform_indices = @transform_0, window_bounds = array<i64: 1, 20, 80>}, {pipeline_mode = #tpu.pipeline_mode<synchronous>, transform_indices = @transform_1, window_bounds = array<i64: 3, 80, 512>}, {pipeline_mode = #tpu.pipeline_mode<synchronous>, transform_indices = @transform_2, window_bounds = array<i64: 1, 512>}, {pipeline_mode = #tpu.pipeline_mode<synchronous>, transform_indices = @transform_3, window_bounds = array<i64: 3, 80, 512>}, {pipeline_mode = #tpu.pipeline_mode<synchronous>, transform_indices = @transform_4, window_bounds = array<i64: 1, 512>}, {pipeline_mode = #tpu.pipeline_mode<synchronous>, transform_indices = @transform_5, window_bounds = array<i64: 32, 32>}, {pipeline_mode = #tpu.pipeline_mode<synchronous>, transform_indices = @transform_6, window_bounds = array<i64: 32, 1>}, {pipeline_mode = #tpu.pipeline_mode<synchronous>, transform_indices = @transform_7, window_bounds = array<i64: 32, 32>}, {pipeline_mode = #tpu.pipeline_mode<synchronous>, transform_indices = @transform_8, window_bounds = array<i64: 32, 32>}, {transform_indices = @transform_9, window_bounds = array<i64: 1, 16, 512>}]} {
    %c0 = arith.constant 0 : index
    %c0_0 = arith.constant 0 : index
    %0 = vector.load %arg3[%c0, %c0_0] : memref<1x512xf32, #tpu.memory_space<vmem>>, vector<1x512xf32>
    %c0_1 = arith.constant 0 : index
    %c0_2 = arith.constant 0 : index
    %1 = vector.load %arg5[%c0_1, %c0_2] : memref<1x512xf32, #tpu.memory_space<vmem>>, vector<1x512xf32>
    %c0_3 = arith.constant 0 : index
    %c0_4 = arith.constant 0 : index
    %2 = vector.load %arg6[%c0_3, %c0_4] : memref<32x32xf32, #tpu.memory_space<vmem>>, vector<32x32xf32>
    %c0_5 = arith.constant 0 : index
    %c0_6 = arith.constant 0 : index
    %3 = vector.load %arg7[%c0_5, %c0_6] : memref<32x1xf32, #tpu.memory_space<vmem>>, vector<32x1xf32>
    %c0_7 = arith.constant 0 : index
    %c0_8 = arith.constant 0 : index
    %4 = vector.load %arg8[%c0_7, %c0_8] : memref<32x32xf32, #tpu.memory_space<vmem>>, vector<32x32xf32>
    %c0_9 = arith.constant 0 : index
    %c0_10 = arith.constant 0 : index
    %5 = vector.load %arg9[%c0_9, %c0_10] : memref<32x32xf32, #tpu.memory_space<vmem>>, vector<32x32xf32>
    %c0_11 = arith.constant 0 : index
    %c0_12 = arith.constant 0 : index
    %c0_13 = arith.constant 0 : index
    %6 = vector.load %arg1[%c0_11, %c0_12, %c0_13] : memref<1x20x80xf32, #tpu.memory_space<vmem>>, vector<1x20x80xf32>
    %7 = vector.shape_cast %6 : vector<1x20x80xf32> to vector<20x80xf32>
    %cst = arith.constant 0.000000e+00 : f32
    %8 = vector.broadcast %cst : f32 to vector<16x512xf32>
    %cst_14 = arith.constant 0.000000e+00 : f32
    %9 = vector.broadcast %cst_14 : f32 to vector<16x512xf32>
    %10 = vector.extract_strided_slice %7 {offsets = [1, 0], sizes = [16, 80], strides = [1, 1]} : vector<20x80xf32> to vector<16x80xf32>
    %11 = arith.truncf %10 : vector<16x80xf32> to vector<16x80xbf16>
    %c0_15 = arith.constant 0 : index
    %c0_16 = arith.constant 0 : index
    %c0_17 = arith.constant 0 : index
    %12 = vector.load %arg2[%c0_15, %c0_16, %c0_17] : memref<3x80x512xbf16, #tpu.memory_space<vmem>>, vector<1x80x512xbf16>
    %13 = vector.shape_cast %12 : vector<1x80x512xbf16> to vector<80x512xbf16>
    %cst_18 = arith.constant dense<0.000000e+00> : vector<16x512xf32>
    %14 = tpu.matmul %11, %13, %cst_18 {dimension_numbers = #tpu.dot_dimension_numbers<[1], [0], [0], [1], [0, 0, 1, 1], [], []>} : vector<16x80xbf16>, vector<80x512xbf16>, vector<16x512xf32> -> vector<16x512xf32>
    %15 = arith.addf %8, %14 : vector<16x512xf32>
    %16 = vector.extract_strided_slice %7 {offsets = [0, 0], sizes = [16, 80], strides = [1, 1]} : vector<20x80xf32> to vector<16x80xf32>
    %17 = arith.truncf %16 : vector<16x80xf32> to vector<16x80xbf16>
    %c0_19 = arith.constant 0 : index
    %c0_20 = arith.constant 0 : index
    %c0_21 = arith.constant 0 : index
    %18 = vector.load %arg4[%c0_19, %c0_20, %c0_21] : memref<3x80x512xbf16, #tpu.memory_space<vmem>>, vector<1x80x512xbf16>
    %19 = vector.shape_cast %18 : vector<1x80x512xbf16> to vector<80x512xbf16>
    %cst_22 = arith.constant dense<0.000000e+00> : vector<16x512xf32>
    %20 = tpu.matmul %17, %19, %cst_22 {dimension_numbers = #tpu.dot_dimension_numbers<[1], [0], [0], [1], [0, 0, 1, 1], [], []>} : vector<16x80xbf16>, vector<80x512xbf16>, vector<16x512xf32> -> vector<16x512xf32>
    %21 = arith.addf %9, %20 : vector<16x512xf32>
    %22 = vector.extract_strided_slice %7 {offsets = [2, 0], sizes = [16, 80], strides = [1, 1]} : vector<20x80xf32> to vector<16x80xf32>
    %23 = arith.truncf %22 : vector<16x80xf32> to vector<16x80xbf16>
    %c1 = arith.constant 1 : index
    %c0_23 = arith.constant 0 : index
    %c0_24 = arith.constant 0 : index
    %24 = vector.load %arg2[%c1, %c0_23, %c0_24] : memref<3x80x512xbf16, #tpu.memory_space<vmem>>, vector<1x80x512xbf16>
    %25 = vector.shape_cast %24 : vector<1x80x512xbf16> to vector<80x512xbf16>
    %cst_25 = arith.constant dense<0.000000e+00> : vector<16x512xf32>
    %26 = tpu.matmul %23, %25, %cst_25 {dimension_numbers = #tpu.dot_dimension_numbers<[1], [0], [0], [1], [0, 0, 1, 1], [], []>} : vector<16x80xbf16>, vector<80x512xbf16>, vector<16x512xf32> -> vector<16x512xf32>
    %27 = arith.addf %15, %26 : vector<16x512xf32>
    %28 = vector.extract_strided_slice %7 {offsets = [2, 0], sizes = [16, 80], strides = [1, 1]} : vector<20x80xf32> to vector<16x80xf32>
    %29 = arith.truncf %28 : vector<16x80xf32> to vector<16x80xbf16>
    %c1_26 = arith.constant 1 : index
    %c0_27 = arith.constant 0 : index
    %c0_28 = arith.constant 0 : index
    %30 = vector.load %arg4[%c1_26, %c0_27, %c0_28] : memref<3x80x512xbf16, #tpu.memory_space<vmem>>, vector<1x80x512xbf16>
    %31 = vector.shape_cast %30 : vector<1x80x512xbf16> to vector<80x512xbf16>
    %cst_29 = arith.constant dense<0.000000e+00> : vector<16x512xf32>
    %32 = tpu.matmul %29, %31, %cst_29 {dimension_numbers = #tpu.dot_dimension_numbers<[1], [0], [0], [1], [0, 0, 1, 1], [], []>} : vector<16x80xbf16>, vector<80x512xbf16>, vector<16x512xf32> -> vector<16x512xf32>
    %33 = arith.addf %21, %32 : vector<16x512xf32>
    %34 = vector.extract_strided_slice %7 {offsets = [3, 0], sizes = [16, 80], strides = [1, 1]} : vector<20x80xf32> to vector<16x80xf32>
    %35 = arith.truncf %34 : vector<16x80xf32> to vector<16x80xbf16>
    %c2 = arith.constant 2 : index
    %c0_30 = arith.constant 0 : index
    %c0_31 = arith.constant 0 : index
    %36 = vector.load %arg2[%c2, %c0_30, %c0_31] : memref<3x80x512xbf16, #tpu.memory_space<vmem>>, vector<1x80x512xbf16>
    %37 = vector.shape_cast %36 : vector<1x80x512xbf16> to vector<80x512xbf16>
    %cst_32 = arith.constant dense<0.000000e+00> : vector<16x512xf32>
    %38 = tpu.matmul %35, %37, %cst_32 {dimension_numbers = #tpu.dot_dimension_numbers<[1], [0], [0], [1], [0, 0, 1, 1], [], []>} : vector<16x80xbf16>, vector<80x512xbf16>, vector<16x512xf32> -> vector<16x512xf32>
    %39 = arith.addf %27, %38 : vector<16x512xf32>
    %40 = vector.extract_strided_slice %7 {offsets = [4, 0], sizes = [16, 80], strides = [1, 1]} : vector<20x80xf32> to vector<16x80xf32>
    %41 = arith.truncf %40 : vector<16x80xf32> to vector<16x80xbf16>
    %c2_33 = arith.constant 2 : index
    %c0_34 = arith.constant 0 : index
    %c0_35 = arith.constant 0 : index
    %42 = vector.load %arg4[%c2_33, %c0_34, %c0_35] : memref<3x80x512xbf16, #tpu.memory_space<vmem>>, vector<1x80x512xbf16>
    %43 = vector.shape_cast %42 : vector<1x80x512xbf16> to vector<80x512xbf16>
    %cst_36 = arith.constant dense<0.000000e+00> : vector<16x512xf32>
    %44 = tpu.matmul %41, %43, %cst_36 {dimension_numbers = #tpu.dot_dimension_numbers<[1], [0], [0], [1], [0, 0, 1, 1], [], []>} : vector<16x80xbf16>, vector<80x512xbf16>, vector<16x512xf32> -> vector<16x512xf32>
    %45 = arith.addf %33, %44 : vector<16x512xf32>
    %46 = vector.broadcast %0 : vector<1x512xf32> to vector<16x512xf32>
    %47 = arith.addf %39, %46 : vector<16x512xf32>
    %cst_37 = arith.constant 0.000000e+00 : f32
    %48 = vector.broadcast %cst_37 : f32 to vector<16x512xf32>
    %49 = arith.maximumf %47, %48 : vector<16x512xf32>
    %50 = vector.broadcast %1 : vector<1x512xf32> to vector<16x512xf32>
    %51 = arith.addf %45, %50 : vector<16x512xf32>
    %cst_38 = arith.constant 0.000000e+00 : f32
    %52 = vector.broadcast %cst_38 : f32 to vector<16x512xf32>
    %53 = arith.maximumf %51, %52 : vector<16x512xf32>
    %54 = arith.addf %49, %53 : vector<16x512xf32>
    %cst_39 = arith.constant dense<0.000000e+00> : vector<512xf32>
    %55 = vector.multi_reduction <add>, %54, %cst_39 [0] : vector<16x512xf32> to vector<512xf32>
    %56 = vector.shape_cast %55 : vector<512xf32> to vector<1x512xf32>
    %57 = vector.extract_strided_slice %56 {offsets = [0, 0], sizes = [1, 32], strides = [1, 1]} : vector<1x512xf32> to vector<1x32xf32>
    %58 = vector.extract_strided_slice %56 {offsets = [0, 32], sizes = [1, 32], strides = [1, 1]} : vector<1x512xf32> to vector<1x32xf32>
    %59 = arith.addf %57, %58 : vector<1x32xf32>
    %60 = vector.extract_strided_slice %56 {offsets = [0, 64], sizes = [1, 32], strides = [1, 1]} : vector<1x512xf32> to vector<1x32xf32>
    %61 = arith.addf %59, %60 : vector<1x32xf32>
    %62 = vector.extract_strided_slice %56 {offsets = [0, 96], sizes = [1, 32], strides = [1, 1]} : vector<1x512xf32> to vector<1x32xf32>
    %63 = arith.addf %61, %62 : vector<1x32xf32>
    %64 = vector.extract_strided_slice %56 {offsets = [0, 128], sizes = [1, 32], strides = [1, 1]} : vector<1x512xf32> to vector<1x32xf32>
    %65 = arith.addf %63, %64 : vector<1x32xf32>
    %66 = vector.extract_strided_slice %56 {offsets = [0, 160], sizes = [1, 32], strides = [1, 1]} : vector<1x512xf32> to vector<1x32xf32>
    %67 = arith.addf %65, %66 : vector<1x32xf32>
    %68 = vector.extract_strided_slice %56 {offsets = [0, 192], sizes = [1, 32], strides = [1, 1]} : vector<1x512xf32> to vector<1x32xf32>
    %69 = arith.addf %67, %68 : vector<1x32xf32>
    %70 = vector.extract_strided_slice %56 {offsets = [0, 224], sizes = [1, 32], strides = [1, 1]} : vector<1x512xf32> to vector<1x32xf32>
    %71 = arith.addf %69, %70 : vector<1x32xf32>
    %72 = vector.extract_strided_slice %56 {offsets = [0, 256], sizes = [1, 32], strides = [1, 1]} : vector<1x512xf32> to vector<1x32xf32>
    %73 = arith.addf %71, %72 : vector<1x32xf32>
    %74 = vector.extract_strided_slice %56 {offsets = [0, 288], sizes = [1, 32], strides = [1, 1]} : vector<1x512xf32> to vector<1x32xf32>
    %75 = arith.addf %73, %74 : vector<1x32xf32>
    %76 = vector.extract_strided_slice %56 {offsets = [0, 320], sizes = [1, 32], strides = [1, 1]} : vector<1x512xf32> to vector<1x32xf32>
    %77 = arith.addf %75, %76 : vector<1x32xf32>
    %78 = vector.extract_strided_slice %56 {offsets = [0, 352], sizes = [1, 32], strides = [1, 1]} : vector<1x512xf32> to vector<1x32xf32>
    %79 = arith.addf %77, %78 : vector<1x32xf32>
    %80 = vector.extract_strided_slice %56 {offsets = [0, 384], sizes = [1, 32], strides = [1, 1]} : vector<1x512xf32> to vector<1x32xf32>
    %81 = arith.addf %79, %80 : vector<1x32xf32>
    %82 = vector.extract_strided_slice %56 {offsets = [0, 416], sizes = [1, 32], strides = [1, 1]} : vector<1x512xf32> to vector<1x32xf32>
    %83 = arith.addf %81, %82 : vector<1x32xf32>
    %84 = vector.extract_strided_slice %56 {offsets = [0, 448], sizes = [1, 32], strides = [1, 1]} : vector<1x512xf32> to vector<1x32xf32>
    %85 = arith.addf %83, %84 : vector<1x32xf32>
    %86 = vector.extract_strided_slice %56 {offsets = [0, 480], sizes = [1, 32], strides = [1, 1]} : vector<1x512xf32> to vector<1x32xf32>
    %87 = arith.addf %85, %86 : vector<1x32xf32>
    %cst_40 = arith.constant 3.906250e-03 : f32
    %88 = vector.broadcast %cst_40 : f32 to vector<1x32xf32>
    %89 = arith.mulf %87, %88 : vector<1x32xf32>
    %90 = vector.broadcast %89 : vector<1x32xf32> to vector<32x32xf32>
    %91 = arith.mulf %2, %90 : vector<32x32xf32>
    %cst_41 = arith.constant dense<0.000000e+00> : vector<32xf32>
    %92 = vector.multi_reduction <add>, %91, %cst_41 [1] : vector<32x32xf32> to vector<32xf32>
    %93 = vector.shape_cast %92 : vector<32xf32> to vector<32x1xf32>
    %94 = arith.addf %93, %3 : vector<32x1xf32>
    %cst_42 = arith.constant 0.000000e+00 : f32
    %95 = vector.broadcast %cst_42 : f32 to vector<32x1xf32>
    %96 = arith.maximumf %94, %95 : vector<32x1xf32>
    %97 = vector.broadcast %96 : vector<32x1xf32> to vector<32x32xf32>
    %98 = arith.mulf %97, %4 : vector<32x32xf32>
    %cst_43 = arith.constant dense<0.000000e+00> : vector<32xf32>
    %99 = vector.multi_reduction <add>, %98, %cst_43 [0] : vector<32x32xf32> to vector<32xf32>
    %100 = vector.shape_cast %99 : vector<32xf32> to vector<1x32xf32>
    %101 = vector.broadcast %96 : vector<32x1xf32> to vector<32x32xf32>
    %102 = arith.mulf %101, %5 : vector<32x32xf32>
    %cst_44 = arith.constant dense<0.000000e+00> : vector<32xf32>
    %103 = vector.multi_reduction <add>, %102, %cst_44 [0] : vector<32x32xf32> to vector<32xf32>
    %104 = vector.shape_cast %103 : vector<32xf32> to vector<1x32xf32>
    %105 = arith.subf %104, %100 : vector<1x32xf32>
    %106 = math.exp %105 : vector<1x32xf32>
    %cst_45 = arith.constant 1.000000e+00 : f32
    %107 = vector.broadcast %cst_45 : f32 to vector<1x32xf32>
    %108 = arith.addf %107, %106 : vector<1x32xf32>
    %109 = tpu.reciprocal %108 : vector<1x32xf32> -> vector<1x32xf32>
    %110 = tpu.concatenate %109, %109, %109, %109, %109, %109, %109, %109, %109, %109, %109, %109, %109, %109, %109, %109 in 1 : vector<1x32xf32>, vector<1x32xf32>, vector<1x32xf32>, vector<1x32xf32>, vector<1x32xf32>, vector<1x32xf32>, vector<1x32xf32>, vector<1x32xf32>, vector<1x32xf32>, vector<1x32xf32>, vector<1x32xf32>, vector<1x32xf32>, vector<1x32xf32>, vector<1x32xf32>, vector<1x32xf32>, vector<1x32xf32> -> vector<1x512xf32>
    %111 = arith.subf %49, %53 : vector<16x512xf32>
    %112 = vector.broadcast %110 : vector<1x512xf32> to vector<16x512xf32>
    %113 = arith.mulf %111, %112 : vector<16x512xf32>
    %114 = arith.addf %53, %113 : vector<16x512xf32>
    %c0_46 = arith.constant 0 : index
    %c0_47 = arith.constant 0 : index
    %c0_48 = arith.constant 0 : index
    %115 = vector.load %arg10[%c0_46, %c0_47, %c0_48] : memref<1x16x512xf32, #tpu.memory_space<vmem>>, vector<1x16x512xf32>
    %116 = vector.shape_cast %115 : vector<1x16x512xf32> to vector<16x512xf32>
    %117 = vector.shape_cast %114 : vector<16x512xf32> to vector<1x16x512xf32>
    tpu.vector_store %arg10[%c0_46, %c0_47, %c0_48], %117 {strides = array<i32>} : memref<1x16x512xf32, #tpu.memory_space<vmem>>, vector<1x16x512xf32>,
    return
  }
  func.func @transform_0(%arg0: i32) -> (i32, i32, i32) {
    %c0_i32 = arith.constant 0 : i32
    %c0_i32_0 = arith.constant 0 : i32
    %c0_i32_1 = arith.constant 0 : i32
    return %arg0, %c0_i32, %c0_i32_0 : i32, i32, i32
  }
  func.func @transform_1(%arg0: i32) -> (i32, i32, i32) {
    %c0_i32 = arith.constant 0 : i32
    %c0_i32_0 = arith.constant 0 : i32
    %c0_i32_1 = arith.constant 0 : i32
    %c0_i32_2 = arith.constant 0 : i32
    return %c0_i32, %c0_i32_0, %c0_i32_1 : i32, i32, i32
  }
  func.func @transform_2(%arg0: i32) -> (i32, i32) {
    %c0_i32 = arith.constant 0 : i32
    %c0_i32_0 = arith.constant 0 : i32
    %c0_i32_1 = arith.constant 0 : i32
    return %c0_i32, %c0_i32_0 : i32, i32
  }
  func.func @transform_3(%arg0: i32) -> (i32, i32, i32) {
    %c0_i32 = arith.constant 0 : i32
    %c0_i32_0 = arith.constant 0 : i32
    %c0_i32_1 = arith.constant 0 : i32
    %c0_i32_2 = arith.constant 0 : i32
    return %c0_i32, %c0_i32_0, %c0_i32_1 : i32, i32, i32
  }
  func.func @transform_4(%arg0: i32) -> (i32, i32) {
    %c0_i32 = arith.constant 0 : i32
    %c0_i32_0 = arith.constant 0 : i32
    %c0_i32_1 = arith.constant 0 : i32
    return %c0_i32, %c0_i32_0 : i32, i32
  }
  func.func @transform_5(%arg0: i32) -> (i32, i32) {
    %c0_i32 = arith.constant 0 : i32
    %c0_i32_0 = arith.constant 0 : i32
    %c0_i32_1 = arith.constant 0 : i32
    return %c0_i32, %c0_i32_0 : i32, i32
  }
  func.func @transform_6(%arg0: i32) -> (i32, i32) {
    %c0_i32 = arith.constant 0 : i32
    %c0_i32_0 = arith.constant 0 : i32
    %c0_i32_1 = arith.constant 0 : i32
    return %c0_i32, %c0_i32_0 : i32, i32
  }
  func.func @transform_7(%arg0: i32) -> (i32, i32) {
    %c0_i32 = arith.constant 0 : i32
    %c0_i32_0 = arith.constant 0 : i32
    %c0_i32_1 = arith.constant 0 : i32
    return %c0_i32, %c0_i32_0 : i32, i32
  }
  func.func @transform_8(%arg0: i32) -> (i32, i32) {
    %c0_i32 = arith.constant 0 : i32
    %c0_i32_0 = arith.constant 0 : i32
    %c0_i32_1 = arith.constant 0 : i32
    return %c0_i32, %c0_i32_0 : i32, i32
  }
  func.func @transform_9(%arg0: i32) -> (i32, i32, i32) {
    %c0_i32 = arith.constant 0 : i32
    %c0_i32_0 = arith.constant 0 : i32
    %c0_i32_1 = arith.constant 0 : i32
    return %arg0, %c0_i32, %c0_i32_0 : i32, i32, i32
  }
}

</mosaic_0001>

<bundles_post_ra>
// kernel: conv_sknet_forward.1
= control target key start
LH: loop header
LB: loop body
LE: loop exit
PB: predicated region body
PF: predicated region fallthrough
CT: control target
= control target key end

     0   :  { %14 = vsyncpa [#allocation3], 0  ;;  %s2540_s30 = smov 0   ;;  %s3016_s0 = inlined_call_operand.vmem [shape: f32[2,20,80], index: 0, kind: input, shape index: {}]   ;;  %s3017_s1 = inlined_call_operand.vmem [shape: bf16[3,80,512], index: 1, kind: input, shape index: {}]   ;;  %s3018_s2 = inlined_call_operand.vmem [shape: f32[1,512], index: 2, kind: input, shape index: {}]   ;;  %s3019_s3 = inlined_call_operand.hbm [shape: bf16[3,80,512], index: 3, kind: input, shape index: {}]   ;;  %s3020_s4 = inlined_call_operand.vmem [shape: f32[1,512], index: 4, kind: input, shape index: {}]   ;;  %s3021_s5 = inlined_call_operand.vmem [shape: f32[32,32], index: 5, kind: input, shape index: {}]   ;;  %s3022_s6 = inlined_call_operand.vmem [shape: f32[32,1], index: 6, kind: input, shape index: {}]   ;;  %s3023_s7 = inlined_call_operand.vmem [shape: f32[32,32], index: 7, kind: input, shape index: {}]   ;;  %s3024_s8 = inlined_call_operand.vmem [shape: f32[32,32], index: 8, kind: input, shape index: {}]   ;;  %s3025_s9 = inlined_call_operand.vmem [shape: f32[2,16,512], index: 9, kind: output, shape index: {}]  }
   0x1 LB: > { %s2546_s10 = sadd.s32 4294967295, %s2481_s30   ;;  %p2050_p0 = scmp.ge.s32.totalorder %s2481_s30, 1  ;;  %s2481_s30 = sphi %s2540_s30, %s20_s30  }
   0x2   : > { %p245_p1 = scmp.lt.s32.totalorder %s2481_s30, 3  ;;  %s2483_s11 = smov [#allocation2]  }
   0x3   : > { %s263_s12 = sshll.u32 %s2483_s11, 4  ;;  %p2242_p3 = scmp.eq.s32.totalorder %s2546_s10, 0  ;;  %s264_s12 = int_to_ptr.vmem [resolvable:$true] %s263_s12 }
   0x4   : > { %p2550_p2 = pnand %p2050_p0, %p245_p1  ;;  %s2456_s14 = scalar_lea.vmem %s264_s12, 7680 }
   0x5   : > { %p2457_p7 = scmp.ne.s32.totalorder %s264_s12, %s2456_s14  ;;  %p2464_p10 = scmp.lt.s32.totalorder %s264_s12, %s264_s12 }
   0x6   : > { %p2238_p4 = pneg %p2550_p2  ;;  %p2465_p11 = scmp.lt.s32.totalorder %s2456_s14, %s2456_s14 }
   0x8   : > { %p2239_p5 = pnand %p2242_p3, %p2238_p4  ;;  %p2466_p12 = por %p2465_p11, %p2464_p10 }
   0xa   : > { %p2447_p6 = pneg %p2239_p5 }
   0xc   : > { %p2459_p8 = pnand %p2457_p7, %p2447_p6 }
   0xe   : > { %p2460_p9 = pneg %p2459_p8 }
  0x10   : > { %p2467_p13 = pnand %p2466_p12, %p2460_p9 }
  0x12   : > { %2470 = shalt.err (!%p2467_p13)
}
  0x13   : > { %s2484_s15 = smov 256   ;;  %s2485_s16 = smov 16  }
  0x14   : > { %2241 = dma.hbm_to_vmem [thread:$0]  (!%p2239_p5), %s3019_s3, 7680, %s264_s12, [#allocation3], %s2484_s15, %s2484_s15, %s2485_s16  }
  0x15   : > { %302 = sbr.rel (%p2550_p2) target bundleno = 982 (0x3d6), region = 56 }
  0x1a   : > { %2476 = dma.done.wait (%p2242_p3), [#allocation3], 7680  }
  0x1b   : > { %2478 = vsyncadd (%p2242_p3), [#allocation3], 4294959616  ;;  %v2486_v0 = vmov 0   ;;  %p338_p0 = scmp.lt.s32.totalorder %s2546_s10, 1  ;;  %v2261_v1 = vld [vmem:[%s3017_s1 + $0x124] ss:$16 sps:$4 sm:$0xff]  }
  0x1c   : > { %575 = vmatprep.mubr.bf16.mxu0 %v2486_v0  ;;  %618 = vmatprep.mubr.bf16.mxu1 %v2486_v0  ;;  %v2263_v2 = vld [vmem:[%s3017_s1 + $0x12c] ss:$16 sps:$4 sm:$0xff]   ;;  %v2265_v3 = vld [vmem:[%s3017_s1 + $0x120] ss:$16 sps:$4 sm:$0xff]   ;;  %v2266_v4 = vld [vmem:[%s3017_s1 + $0x128] ss:$16 sps:$4 sm:$0xff]  }
  0x1d   : > { %2260 = vset.pattern.permute.xlu0 %v2486_v0  ;;  %2259 = vset.pattern.permute.xlu1 %v2486_v0  ;;  %s3034_s10 = smov (!%p338_p0, %s2546_s10), 1  ;;  %v2267_v5 = vld [vmem:[%s3017_s1 + $0x104] ss:$16 sps:$4 sm:$0xff]   ;;  %v2269_v6 = vld [vmem:[%s3017_s1 + $0x10c] ss:$16 sps:$4 sm:$0xff]   ;;  %vm435_vm0 = vcmask 1046528  }
  0x1e   : > { %549 = vmatprep.subr.bf16.mxu0 %v2261_v1  ;;  %592 = vmatprep.subr.bf16.mxu1 %v2263_v2  ;;  %v2271_v7 = vld [vmem:[%s3017_s1 + $0x100] ss:$16 sps:$4 sm:$0xff]   ;;  %v2272_v8 = vld [vmem:[%s3017_s1 + $0x108] ss:$16 sps:$4 sm:$0xff]   ;;  %v2273_v9 = vld [vmem:[%s3017_s1 + $0xe4] ss:$16 sps:$4 sm:$0xff]  }
  0x1f   : > { %550 = vmatpush1.bf16.msra.mxu0 %v2265_v3  ;;  %593 = vmatpush1.bf16.msra.mxu1 %v2266_v4  ;;  %s2233_s18 = smul.u32 24, %s3034_s10  ;;  %v2275_v10 = vld [vmem:[%s3017_s1 + $0xec] ss:$16 sps:$4 sm:$0xff]   ;;  %v2277_v11 = vld [vmem:[%s3017_s1 + $0xe0] ss:$16 sps:$4 sm:$0xff]   ;;  %vm539_vm1 = vcmask 654336  }
  0x20   : > { %551 = vmatprep.subr.bf16.mxu0 %v2267_v5  ;;  %594 = vmatprep.subr.bf16.mxu1 %v2269_v6  ;;  %v2278_v12 = vld [vmem:[%s3017_s1 + $0xe8] ss:$16 sps:$4 sm:$0xff]   ;;  %v2279_v13 = vld [vmem:[%s3017_s1 + $0xc4] ss:$16 sps:$4 sm:$0xff]   ;;  %v2281_v14 = vld [vmem:[%s3017_s1 + $0xcc] ss:$16 sps:$4 sm:$0xff]  }
  0x21   : > { %s342_s12 = scalar_lea.vmem %s3016_s0, %s2233_s18  ;;  %v2283_v15 = vld [vmem:[%s3017_s1 + $0xc0] ss:$16 sps:$4 sm:$0xff]   ;;  %v2284_v16 = vld [vmem:[%s3017_s1 + $0xc8] ss:$16 sps:$4 sm:$0xff]   ;;  %v2285_v17 = vld [vmem:[%s3017_s1 + $0xa4] ss:$16 sps:$4 sm:$0xff]  }
  0x22   : > { %v2287_v18 = vld [vmem:[%s3017_s1 + $0xac] ss:$16 sps:$4 sm:$0xff]   ;;  %v367_v19 = vld [vmem:[%s342_s12] sm:$0xff]  ;;  %v369_v21 = vld [vmem:[%s342_s12 + $0x10] sm:$0xf]  ;;  %vm1475_vm4 = vcmask 1045504  }
  0x23   : > { %552 = vmatpush1.bf16.msra.mxu0 %v2271_v7  ;;  %595 = vmatpush1.bf16.msra.mxu1 %v2272_v8  ;;  %v368_v20 = vld [vmem:[%s342_s12 + $0x8] sm:$0xff]  ;;  %v2289_v23 = vld [vmem:[%s3017_s1 + $0xa0] ss:$16 sps:$4 sm:$0xff]   ;;  %v2639_v24 = vpack.c.bf16 %v369_v21, %v369_v21  ;;  %v2293_v27 = vld [vmem:[%s3017_s1 + $0x84] ss:$16 sps:$4 sm:$0xff]   ;;  %s2487_s14 = smov 32  }
  0x24   : > { %553 = vmatprep.subr.bf16.mxu0 %v2273_v9  ;;  %596 = vmatprep.subr.bf16.mxu1 %v2275_v10  ;;  %v2634_v22 = vpack.c.bf16 %v368_v20, %v367_v19  ;;  %v2290_v25 = vld [vmem:[%s3017_s1 + $0xa8] ss:$16 sps:$4 sm:$0xff]   ;;  %v2296_v29 = vld [vmem:[%s3017_s1 + $0x8c] ss:$16 sps:$4 sm:$0xff]   ;;  %v2291_v30 = vld [vmem:[%s3017_s1 + $0x80] ss:$16 sps:$4 sm:$0xff]  }
  0x25   : > { %v437_v28 = vrot.slane %v2639_v24, 1  ;;  %v2294_v32 = vld [vmem:[%s3017_s1 + $0x88] ss:$16 sps:$4 sm:$0xff]   ;;  %v2299_v33 = vld [vmem:[%s3017_s1 + $0x64] ss:$16 sps:$4 sm:$0xff]   ;;  %v638_v46 = vshll.u32 %v2639_v24, 16 }
  0x26   : > { %v436_v26 = vrot.slane %v2634_v22, 1  ;;  %v2302_v34 = vld [vmem:[%s3017_s1 + $0x6c] ss:$16 sps:$4 sm:$0xff]   ;;  %v2297_v35 = vld [vmem:[%s3017_s1 + $0x60] ss:$16 sps:$4 sm:$0xff]   ;;  %v633_v42 = vshll.u32 %v2634_v22, 16 }
  0x27   : > { %554 = vmatpush1.bf16.msra.mxu0 %v2277_v11  ;;  %597 = vmatpush1.bf16.msra.mxu1 %v2278_v12  ;;  %v2300_v36 = vld [vmem:[%s3017_s1 + $0x68] ss:$16 sps:$4 sm:$0xff]   ;;  %v2305_v37 = vld [vmem:[%s3017_s1 + $0x44] ss:$16 sps:$4 sm:$0xff]   ;;  %v2308_v38 = vld [vmem:[%s3017_s1 + $0x4c] ss:$16 sps:$4 sm:$0xff]  }
  0x28   : > { %555 = vmatprep.subr.bf16.mxu0 %v2279_v13  ;;  %598 = vmatprep.subr.bf16.mxu1 %v2281_v14  ;;  %v2655_v31 = vsel %vm435_vm0, %v436_v26, %v437_v28  ;;  %v2303_v39 = vld [vmem:[%s3017_s1 + $0x40] ss:$16 sps:$4 sm:$0xff]   ;;  %v2306_v40 = vld [vmem:[%s3017_s1 + $0x48] ss:$16 sps:$4 sm:$0xff]   ;;  %v2311_v41 = vld [vmem:[%s3017_s1 + $0x24] ss:$16 sps:$4 sm:$0xff]  }
  0x29   : > { %v2314_v43 = vld [vmem:[%s3017_s1 + $0x2c] ss:$16 sps:$4 sm:$0xff]   ;;  %v2309_v44 = vld [vmem:[%s3017_s1 + $0x20] ss:$16 sps:$4 sm:$0xff]   ;;  %v631_v45 = vshrl.u32 %v2634_v22, 16  ;;  %v635_v49 = vrot.slane %v633_v42, 1 }
  0x2a   : > { %v2312_v47 = vld [vmem:[%s3017_s1 + $0x28] ss:$16 sps:$4 sm:$0xff]   ;;  %v2317_v48 = vld [vmem:[%s3017_s1 + $0x4] ss:$16 sps:$4 sm:$0xff]   ;;  %v2320_v50 = vld [vmem:[%s3017_s1 + $0xc] ss:$16 sps:$4 sm:$0xff]  }
  0x2b   : > { %556 = vmatpush1.bf16.msra.mxu0 %v2283_v15  ;;  %599 = vmatpush1.bf16.msra.mxu1 %v2284_v16  ;;  %v2315_v51 = vld [vmem:[%s3017_s1] ss:$16 sps:$4 sm:$0xff]   ;;  %v2318_v52 = vld [vmem:[%s3017_s1 + $0x8] ss:$16 sps:$4 sm:$0xff]   ;;  %v636_v53 = vor.u32 %v635_v49, %v631_v45  ;;  %v640_v54 = vrot.slane %v638_v46, 1  ;;  %s2488_s15 = smov 96  }
  0x2c   : > { %557 = vmatprep.subr.bf16.mxu0 %v2285_v17  ;;  %600 = vmatprep.subr.bf16.mxu1 %v2287_v18  ;;  %v2323_v55 = vld [vmem:[#allocation2 + $0x124] ss:$16 sps:$4 sm:$0xff]   ;;  %vm629_vm2 = vsmask.f32 7424  ;;  %v2326_v56 = vld [vmem:[#allocation2 + $0x12c] ss:$16 sps:$4 sm:$0xff]  }
  0x2d   : > { %v2321_v57 = vld [vmem:[#allocation2 + $0x120] ss:$16 sps:$4 sm:$0xff]   ;;  %v641_v58 = vsel %vm629_vm2, %v636_v53, %v640_v54  ;;  %v2324_v59 = vld [vmem:[#allocation2 + $0x128] ss:$16 sps:$4 sm:$0xff]   ;;  %v2329_v60 = vld [vmem:[#allocation2 + $0x104] ss:$16 sps:$4 sm:$0xff]  }
  0x2e   : > { %v2332_v61 = vld [vmem:[#allocation2 + $0x10c] ss:$16 sps:$4 sm:$0xff]   ;;  %v2327_v62 = vld [vmem:[#allocation2 + $0x100] ss:$16 sps:$4 sm:$0xff]   ;;  %v2330_v63 = vld [vmem:[#allocation2 + $0x108] ss:$16 sps:$4 sm:$0xff]  }
  0x2f   : > { %558 = vmatpush1.bf16.msra.mxu0 %v2289_v23  ;;  %601 = vmatpush1.bf16.msra.mxu1 %v2290_v25  ;;  %v2335_v1 = vld [vmem:[#allocation2 + $0xe4] ss:$16 sps:$4 sm:$0xff]   ;;  %v2338_v2 = vld [vmem:[#allocation2 + $0xec] ss:$16 sps:$4 sm:$0xff]   ;;  %v2333_v3 = vld [vmem:[#allocation2 + $0xe0] ss:$16 sps:$4 sm:$0xff]  }
  0x30   : > { %751 = vmatprep.subr.bf16.mxu0 %v2293_v27  ;;  %794 = vmatprep.subr.bf16.mxu1 %v2296_v29  ;;  %v2336_v4 = vld [vmem:[#allocation2 + $0xe8] ss:$16 sps:$4 sm:$0xff]   ;;  %v2341_v5 = vld [vmem:[#allocation2 + $0xc4] ss:$16 sps:$4 sm:$0xff]   ;;  %v2344_v6 = vld [vmem:[#allocation2 + $0xcc] ss:$16 sps:$4 sm:$0xff]  }
  0x31   : > { %v2339_v7 = vld [vmem:[#allocation2 + $0xc0] ss:$16 sps:$4 sm:$0xff]   ;;  %v2342_v8 = vld [vmem:[#allocation2 + $0xc8] ss:$16 sps:$4 sm:$0xff]   ;;  %v2347_v9 = vld [vmem:[#allocation2 + $0xa4] ss:$16 sps:$4 sm:$0xff]  }
  0x32   : > { %2098 = vmatmul.mubr.msk.bf16.vlgmr.msra.gmra.mxu0 %vm539_vm1, %v2655_v31  ;;  %2099 = vmatmul.mubr.msk.bf16.vlgmr.msra.gmra.mxu1 %vm539_vm1, %v2655_v31  ;;  %v2350_v10 = vld [vmem:[#allocation2 + $0xac] ss:$16 sps:$4 sm:$0xff]   ;;  %v2345_v11 = vld [vmem:[#allocation2 + $0xa0] ss:$16 sps:$4 sm:$0xff]   ;;  %v2348_v12 = vld [vmem:[#allocation2 + $0xa8] ss:$16 sps:$4 sm:$0xff]  }
  0x33   : > { %752 = vmatpush1.bf16.msra.mxu0 %v2291_v30  ;;  %795 = vmatpush1.bf16.msra.mxu1 %v2294_v32  ;;  %v2353_v13 = vld [vmem:[#allocation2 + $0x84] ss:$16 sps:$4 sm:$0xff]   ;;  %v2356_v14 = vld [vmem:[#allocation2 + $0x8c] ss:$16 sps:$4 sm:$0xff]   ;;  %v2351_v15 = vld [vmem:[#allocation2 + $0x80] ss:$16 sps:$4 sm:$0xff]  }
  0x34   : > { %753 = vmatprep.subr.bf16.mxu0 %v2299_v33  ;;  %796 = vmatprep.subr.bf16.mxu1 %v2302_v34  ;;  %v2354_v16 = vld [vmem:[#allocation2 + $0x88] ss:$16 sps:$4 sm:$0xff]   ;;  %v2359_v17 = vld [vmem:[#allocation2 + $0x64] ss:$16 sps:$4 sm:$0xff]   ;;  %v2362_v18 = vld [vmem:[#allocation2 + $0x6c] ss:$16 sps:$4 sm:$0xff]  }
  0x35   : > { %777 = vmatprep.mubr.bf16.mxu0 %v2486_v0  ;;  %820 = vmatprep.mubr.bf16.mxu1 %v2486_v0  ;;  %v2357_v19 = vld [vmem:[#allocation2 + $0x60] ss:$16 sps:$4 sm:$0xff]   ;;  %v2360_v20 = vld [vmem:[#allocation2 + $0x68] ss:$16 sps:$4 sm:$0xff]   ;;  %v2365_v21 = vld [vmem:[#allocation2 + $0x44] ss:$16 sps:$4 sm:$0xff]  }
  0x36   : > { %v2368_v23 = vld [vmem:[#allocation2 + $0x4c] ss:$16 sps:$4 sm:$0xff]   ;;  %v2363_v25 = vld [vmem:[#allocation2 + $0x40] ss:$16 sps:$4 sm:$0xff]   ;;  %v2366_v26 = vld [vmem:[#allocation2 + $0x48] ss:$16 sps:$4 sm:$0xff]  }
  0x37   : > { %754 = vmatpush1.bf16.msra.mxu0 %v2297_v35  ;;  %797 = vmatpush1.bf16.msra.mxu1 %v2300_v36  ;;  %v2371_v27 = vld [vmem:[#allocation2 + $0x24] ss:$16 sps:$4 sm:$0xff]   ;;  %v2374_v28 = vld [vmem:[#allocation2 + $0x2c] ss:$16 sps:$4 sm:$0xff]   ;;  %v2369_v29 = vld [vmem:[#allocation2 + $0x20] ss:$16 sps:$4 sm:$0xff]  }
  0x38   : > { %755 = vmatprep.subr.bf16.mxu0 %v2305_v37  ;;  %798 = vmatprep.subr.bf16.mxu1 %v2308_v38  ;;  %v2372_v30 = vld [vmem:[#allocation2 + $0x28] ss:$16 sps:$4 sm:$0xff]   ;;  %v2380_v32 = vld [vmem:[#allocation2 + $0xc] ss:$16 sps:$4 sm:$0xff]   ;;  %v2375_v33 = vld [vmem:[#allocation2] ss:$16 sps:$4 sm:$0xff]  }
  0x39   : > { %v2378_v34 = vld [vmem:[#allocation2 + $0x8] ss:$16 sps:$4 sm:$0xff]   ;;  %v2383_v35 = vld [vmem:[%s3017_s1 + $0x1c4] ss:$16 sps:$4 sm:$0xff]   ;;  %v2386_v36 = vld [vmem:[%s3017_s1 + $0x1cc] ss:$16 sps:$4 sm:$0xff]  }
  0x3a   : > { %v2381_v37 = vld [vmem:[%s3017_s1 + $0x1c0] ss:$16 sps:$4 sm:$0xff]   ;;  %v2384_v38 = vld [vmem:[%s3017_s1 + $0x1c8] ss:$16 sps:$4 sm:$0xff]   ;;  %v1248_v53 = vrot.slane %v631_v45, 1  ;;  %v1249_v54 = vrot.slane %v633_v42, 2 }
  0x3b   : > { %756 = vmatpush1.bf16.msra.mxu0 %v2303_v39  ;;  %799 = vmatpush1.bf16.msra.mxu1 %v2306_v40  ;;  %v2389_v39 = vld [vmem:[%s3017_s1 + $0x1a4] ss:$16 sps:$4 sm:$0xff]   ;;  %v2392_v40 = vld [vmem:[%s3017_s1 + $0x1ac] ss:$16 sps:$4 sm:$0xff]   ;;  %v2396_v49 = vld [vmem:[%s3017_s1 + $0x188] ss:$16 sps:$4 sm:$0xff]  }
  0x3c   : > { %757 = vmatprep.subr.bf16.mxu0 %v2311_v41  ;;  %800 = vmatprep.subr.bf16.mxu1 %v2314_v43  ;;  %v2387_v41 = vld [vmem:[%s3017_s1 + $0x1a0] ss:$16 sps:$4 sm:$0xff]   ;;  %v2390_v43 = vld [vmem:[%s3017_s1 + $0x1a8] ss:$16 sps:$4 sm:$0xff]   ;;  %v2407_v42 = vld [vmem:[%s3017_s1 + $0x144] ss:$16 sps:$4 sm:$0xff]  }
  0x3d   : > { %v2410_v45 = vld [vmem:[%s3017_s1 + $0x14c] ss:$16 sps:$4 sm:$0xff]   ;;  %vm1247_vm3 = vsmask.f32 6400  ;;  %s2489_s16 = smov 64   ;;  %vm1850_vm5 = vcmask 261120  }
  0x3e   : > { %vm1941_vm6 = vcmask 523264   ;;  %vm1943_vm7 = vcmask 785408   ;;  %s2232_s17 = sshll.u32 %s3034_s10, 6 }
  0x3f   : > { %758 = vmatpush1.bf16.msra.mxu0 %v2309_v44  ;;  %801 = vmatpush1.bf16.msra.mxu1 %v2312_v47  ;;  %v2395_v44 = vld [vmem:[%s3017_s1 + $0x184] ss:$16 sps:$4 sm:$0xff]   ;;  %v2398_v47 = vld [vmem:[%s3017_s1 + $0x18c] ss:$16 sps:$4 sm:$0xff]  }
  0x40   : > { %759 = vmatprep.subr.bf16.mxu0 %v2317_v48  ;;  %802 = vmatprep.subr.bf16.mxu1 %v2320_v50  ;;  %v2393_v48 = vld [vmem:[%s3017_s1 + $0x180] ss:$16 sps:$4 sm:$0xff]   ;;  %v1251_v50 = vshrl.u32 %v2639_v24, 16 }
  0x43   : > { %760 = vmatpush1.bf16.msra.mxu0 %v2315_v51  ;;  %803 = vmatpush1.bf16.msra.mxu1 %v2318_v52  ;;  %v2401_v51 = vld [vmem:[%s3017_s1 + $0x164] ss:$16 sps:$4 sm:$0xff]   ;;  %v2404_v52 = vld [vmem:[%s3017_s1 + $0x16c] ss:$16 sps:$4 sm:$0xff]  }
  0x44   : > { %958 = vmatprep.subr.bf16.mxu0 %v2323_v55  ;;  %1001 = vmatprep.subr.bf16.mxu1 %v2326_v56  ;;  %v2399_v55 = vld [vmem:[%s3017_s1 + $0x160] ss:$16 sps:$4 sm:$0xff]   ;;  %v2402_v56 = vld [vmem:[%s3017_s1 + $0x168] ss:$16 sps:$4 sm:$0xff]  }
  0x46   : > { %2120 = vmatmul.mubr.msk.bf16.vlgmr.msra.gmra.mxu0 %vm539_vm1, %v641_v58  ;;  %2121 = vmatmul.mubr.msk.bf16.vlgmr.msra.gmra.mxu1 %vm539_vm1, %v641_v58  ;;  %v1254_v58 = vrot.slane %v638_v46, 2  ;;  %v2408_v46 = vld [vmem:[%s3017_s1 + $0x148] ss:$16 sps:$4 sm:$0xff]  }
  0x47   : > { %959 = vmatpush1.bf16.msra.mxu0 %v2321_v57  ;;  %1002 = vmatpush1.bf16.msra.mxu1 %v2324_v59  ;;  %v1253_v57 = vrot.slane %v1251_v50, 1  ;;  %v2405_v59 = vld [vmem:[%s3017_s1 + $0x140] ss:$16 sps:$4 sm:$0xff]  }
  0x48   : > { %960 = vmatprep.subr.bf16.mxu0 %v2329_v60  ;;  %1003 = vmatprep.subr.bf16.mxu1 %v2332_v61  ;;  %v1250_v60 = vor.u32 %v1249_v54, %v1248_v53 }
  0x49   : > { %984 = vmatprep.mubr.bf16.mxu0 %v2486_v0  ;;  %1027 = vmatprep.mubr.bf16.mxu1 %v2486_v0  ;;  %v1255_v61 = vor.u32 %v1254_v58, %v1253_v57  ;;  %v1677_v57 = vlaneseq }
  0x4b   : > { %961 = vmatpush1.bf16.msra.mxu0 %v2327_v62  ;;  %1004 = vmatpush1.bf16.msra.mxu1 %v2330_v63  ;;  %v2413_v62 = vld [vmem:[#allocation2 + $0x1c4] ss:$16 sps:$4 sm:$0xff]   ;;  %v2416_v63 = vld [vmem:[#allocation2 + $0x1cc] ss:$16 sps:$4 sm:$0xff]  }
  0x4c   : > { %962 = vmatprep.subr.bf16.mxu0 %v2335_v1  ;;  %1005 = vmatprep.subr.bf16.mxu1 %v2338_v2  ;;  %v1256_v1 = vsel %vm1247_vm3, %v1250_v60, %v1255_v61  ;;  %v2411_v2 = vld [vmem:[#allocation2 + $0x1c0] ss:$16 sps:$4 sm:$0xff]  }
  0x4f   : > { %963 = vmatpush1.bf16.msra.mxu0 %v2333_v3  ;;  %1006 = vmatpush1.bf16.msra.mxu1 %v2336_v4  ;;  %v2414_v3 = vld [vmem:[#allocation2 + $0x1c8] ss:$16 sps:$4 sm:$0xff]   ;;  %v2419_v4 = vld [vmem:[#allocation2 + $0x1a4] ss:$16 sps:$4 sm:$0xff]  }
  0x50   : > { %964 = vmatprep.subr.bf16.mxu0 %v2341_v5  ;;  %1007 = vmatprep.subr.bf16.mxu1 %v2344_v6  ;;  %v2422_v5 = vld [vmem:[#allocation2 + $0x1ac] ss:$16 sps:$4 sm:$0xff]   ;;  %v2417_v6 = vld [vmem:[#allocation2 + $0x1a0] ss:$16 sps:$4 sm:$0xff]  }
  0x53   : > { %965 = vmatpush1.bf16.msra.mxu0 %v2339_v7  ;;  %1008 = vmatpush1.bf16.msra.mxu1 %v2342_v8  ;;  %v2420_v7 = vld [vmem:[#allocation2 + $0x1a8] ss:$16 sps:$4 sm:$0xff]   ;;  %v2425_v8 = vld [vmem:[#allocation2 + $0x184] ss:$16 sps:$4 sm:$0xff]  }
  0x54   : > { %966 = vmatprep.subr.bf16.mxu0 %v2347_v9  ;;  %1009 = vmatprep.subr.bf16.mxu1 %v2350_v10  ;;  %v2428_v9 = vld [vmem:[#allocation2 + $0x18c] ss:$16 sps:$4 sm:$0xff]   ;;  %v2423_v10 = vld [vmem:[#allocation2 + $0x180] ss:$16 sps:$4 sm:$0xff]  }
  0x57   : > { %967 = vmatpush1.bf16.msra.mxu0 %v2345_v11  ;;  %1010 = vmatpush1.bf16.msra.mxu1 %v2348_v12  ;;  %v2426_v11 = vld [vmem:[#allocation2 + $0x188] ss:$16 sps:$4 sm:$0xff]   ;;  %v2431_v12 = vld [vmem:[#allocation2 + $0x164] ss:$16 sps:$4 sm:$0xff]  }
  0x58   : > { %1146 = vmatprep.subr.bf16.mxu0 %v2353_v13  ;;  %1189 = vmatprep.subr.bf16.mxu1 %v2356_v14  ;;  %v2434_v13 = vld [vmem:[#allocation2 + $0x16c] ss:$16 sps:$4 sm:$0xff]   ;;  %v2429_v14 = vld [vmem:[#allocation2 + $0x160] ss:$16 sps:$4 sm:$0xff]  }
  0x5a   : > { %2142 = vmatmul.mubr.msk.bf16.vlgmr.msra.gmra.mxu0 %vm539_vm1, %v2655_v31  ;;  %2143 = vmatmul.mubr.msk.bf16.vlgmr.msra.gmra.mxu1 %vm539_vm1, %v2655_v31  ;;  %v2377_v31 = vld [vmem:[#allocation2 + $0x4] ss:$16 sps:$4 sm:$0xff]  }
  0x5b   : > { %1147 = vmatpush1.bf16.msra.mxu0 %v2351_v15  ;;  %1190 = vmatpush1.bf16.msra.mxu1 %v2354_v16  ;;  %v2432_v15 = vld [vmem:[#allocation2 + $0x168] ss:$16 sps:$4 sm:$0xff]   ;;  %v2437_v16 = vld [vmem:[#allocation2 + $0x144] ss:$16 sps:$4 sm:$0xff]  }
  0x5c   : > { %1148 = vmatprep.subr.bf16.mxu0 %v2359_v17  ;;  %1191 = vmatprep.subr.bf16.mxu1 %v2362_v18  ;;  %v2440_v17 = vld [vmem:[#allocation2 + $0x14c] ss:$16 sps:$4 sm:$0xff]   ;;  %v2435_v18 = vld [vmem:[#allocation2 + $0x140] ss:$16 sps:$4 sm:$0xff]  }
  0x5d   : > { %1172 = vmatprep.mubr.bf16.mxu0 %v2486_v0  ;;  %1215 = vmatprep.mubr.bf16.mxu1 %v2486_v0 }
  0x5f   : > { %1149 = vmatpush1.bf16.msra.mxu0 %v2357_v19  ;;  %1192 = vmatpush1.bf16.msra.mxu1 %v2360_v20  ;;  %v1476_v19 = vrot.slane %v2634_v22, 2  ;;  %v1477_v20 = vrot.slane %v2639_v24, 2 }
  0x60   : > { %1150 = vmatprep.subr.bf16.mxu0 %v2365_v21  ;;  %1193 = vmatprep.subr.bf16.mxu1 %v2368_v23 }
  0x61   : > { %v1478_v21 = vsel %vm1475_vm4, %v1476_v19, %v1477_v20 }
  0x63   : > { %1151 = vmatpush1.bf16.msra.mxu0 %v2363_v25  ;;  %1194 = vmatpush1.bf16.msra.mxu1 %v2366_v26 }
  0x64   : > { %1152 = vmatprep.subr.bf16.mxu0 %v2371_v27  ;;  %1195 = vmatprep.subr.bf16.mxu1 %v2374_v28 }
  0x67   : > { %1153 = vmatpush1.bf16.msra.mxu0 %v2369_v29  ;;  %1196 = vmatpush1.bf16.msra.mxu1 %v2372_v30 }
  0x68   : > { %1154 = vmatprep.subr.bf16.mxu0 %v2377_v31  ;;  %1197 = vmatprep.subr.bf16.mxu1 %v2380_v32 }
  0x6b   : > { %1155 = vmatpush1.bf16.msra.mxu0 %v2375_v33  ;;  %1198 = vmatpush1.bf16.msra.mxu1 %v2378_v34 }
  0x6c   : > { %1366 = vmatprep.subr.bf16.mxu0 %v2383_v35  ;;  %1409 = vmatprep.subr.bf16.mxu1 %v2386_v36 }
  0x6e   : > { %2164 = vmatmul.mubr.msk.bf16.vlgmr.msra.gmra.mxu0 %vm539_vm1, %v2634_v22  ;;  %2165 = vmatmul.mubr.msk.bf16.vlgmr.msra.gmra.mxu1 %vm539_vm1, %v2634_v22 }
  0x6f   : > { %1367 = vmatpush1.bf16.msra.mxu0 %v2381_v37  ;;  %1410 = vmatpush1.bf16.msra.mxu1 %v2384_v38 }
  0x70   : > { %1368 = vmatprep.subr.bf16.mxu0 %v2389_v39  ;;  %1411 = vmatprep.subr.bf16.mxu1 %v2392_v40 }
  0x71   : > { %1392 = vmatprep.mubr.bf16.mxu0 %v2486_v0  ;;  %1435 = vmatprep.mubr.bf16.mxu1 %v2486_v0 }
  0x73   : > { %1369 = vmatpush1.bf16.msra.mxu0 %v2387_v41  ;;  %1412 = vmatpush1.bf16.msra.mxu1 %v2390_v43 }
  0x74   : > { %1370 = vmatprep.subr.bf16.mxu0 %v2395_v44  ;;  %1413 = vmatprep.subr.bf16.mxu1 %v2398_v47 }
  0x77   : > { %1371 = vmatpush1.bf16.msra.mxu0 %v2393_v48  ;;  %1414 = vmatpush1.bf16.msra.mxu1 %v2396_v49 }
  0x78   : > { %1372 = vmatprep.subr.bf16.mxu0 %v2401_v51  ;;  %1415 = vmatprep.subr.bf16.mxu1 %v2404_v52 }
  0x7b   : > { %1373 = vmatpush1.bf16.msra.mxu0 %v2399_v55  ;;  %1416 = vmatpush1.bf16.msra.mxu1 %v2402_v56 }
  0x7c   : > { %1374 = vmatprep.subr.bf16.mxu0 %v2407_v42  ;;  %1417 = vmatprep.subr.bf16.mxu1 %v2410_v45  ;;  %v1678_v45 = vshrl.u32 %v1677_v57, 7 }
  0x7e   : > { %v2816_v60 = vsub.s32 0, %v1678_v45  ;;  %v1687_v61 = vsub.s32 2, %v1678_v45 }
  0x7f   : > { %1375 = vmatpush1.bf16.msra.mxu0 %v2405_v59  ;;  %1418 = vmatpush1.bf16.msra.mxu1 %v2408_v46 }
  0x80   : > { %1588 = vmatprep.subr.bf16.mxu0 %v2413_v62  ;;  %1631 = vmatprep.subr.bf16.mxu1 %v2416_v63  ;;  %v1683_v62 = vsub.s32 1, %v1678_v45  ;;  %v1691_v63 = vsub.s32 3, %v1678_v45 }
  0x82   : > { %2206 = vmatmul.mubr.msk.bf16.vlgmr.msra.gmra.mxu0 %vm539_vm1, %v1256_v1  ;;  %2207 = vmatmul.mubr.msk.bf16.vlgmr.msra.gmra.mxu1 %vm539_vm1, %v1256_v1  ;;  %v349_v1 = vld [vmem:[%s3018_s2] sm:$0xf] }
  0x83   : > { %1589 = vmatpush1.bf16.msra.mxu0 %v2411_v2  ;;  %1632 = vmatpush1.bf16.msra.mxu1 %v2414_v3 }
  0x84   : > { %1590 = vmatprep.subr.bf16.mxu0 %v2419_v4  ;;  %1633 = vmatprep.subr.bf16.mxu1 %v2422_v5  ;;  %v350_v4 = vld [vmem:[%s3020_s4] sm:$0xf]  ;;  %v1680_v5 = vrot.slane %v349_v1, %v2816_v60 }
  0x85   : > { %1614 = vmatprep.mubr.bf16.mxu0 %v2486_v0  ;;  %1657 = vmatprep.mubr.bf16.mxu1 %v2486_v0  ;;  %v2438_v0 = vld [vmem:[#allocation2 + $0x148] ss:$16 sps:$4 sm:$0xff]  }
  0x87   : > { %1591 = vmatpush1.bf16.msra.mxu0 %v2417_v6  ;;  %1634 = vmatpush1.bf16.msra.mxu1 %v2420_v7  ;;  %v1688_v6 = vrot.slane %v349_v1, %v1687_v61  ;;  %v2825_v7 = vrot.slane %v349_v1, %v1683_v62 }
  0x88   : > { %1592 = vmatprep.subr.bf16.mxu0 %v2425_v8  ;;  %1635 = vmatprep.subr.bf16.mxu1 %v2428_v9  ;;  %v2827_v8 = vrot.slane %v349_v1, %v1691_v63 }
  0x89   : > { %3029 = vst [vmem:[#allocation5_spill] sm:$0xff] %v2825_v7 }
  0x8a   : > { %3030 = vst [vmem:[#allocation6_spill] sm:$0xff] %v2827_v8 }
  0x8b   : > { %1593 = vmatpush1.bf16.msra.mxu0 %v2423_v10  ;;  %1636 = vmatpush1.bf16.msra.mxu1 %v2426_v11  ;;  %v1717_v11 = vrot.slane %v350_v4, %v2816_v60 }
  0x8c   : > { %1594 = vmatprep.subr.bf16.mxu0 %v2431_v12  ;;  %1637 = vmatprep.subr.bf16.mxu1 %v2434_v13  ;;  %v1725_v12 = vrot.slane %v350_v4, %v1687_v61 }
  0x8f   : > { %1595 = vmatpush1.bf16.msra.mxu0 %v2429_v14  ;;  %1638 = vmatpush1.bf16.msra.mxu1 %v2432_v15 }
  0x90   : > { %1596 = vmatprep.subr.bf16.mxu0 %v2437_v16  ;;  %1639 = vmatprep.subr.bf16.mxu1 %v2440_v17  ;;  %v1721_v17 = vrot.slane %v350_v4, %v1683_v62 }
  0x93   : > { %1597 = vmatpush1.bf16.msra.mxu0 %v2435_v18  ;;  %1640 = vmatpush1.bf16.msra.mxu1 %v2438_v0  ;;  %v1729_v18 = vrot.slane %v350_v4, %v1691_v63 }
  0x96   : > { %2228 = vmatmul.mubr.msk.bf16.vlgmr.msra.gmra.mxu0 %vm539_vm1, %v1478_v21  ;;  %2229 = vmatmul.mubr.msk.bf16.vlgmr.msra.gmra.mxu1 %vm539_vm1, %v1478_v21 }
  0xf2   : > { %v620_v23 = vpop.f32.mrf.mxu1  ;;  %v577_v25 = vpop.f32.mrf.mxu0 }
  0xf4   : > { %v622_v26 = vpop.f32.mrf.mxu1  ;;  %v579_v27 = vpop.f32.mrf.mxu0 }
  0xf6   : > { %v624_v28 = vpop.f32.mrf.mxu1  ;;  %v581_v29 = vpop.f32.mrf.mxu0 }
  0xf8   : > { %v626_v30 = vpop.f32.mrf.mxu1  ;;  %v583_v22 = vpop.f32.mrf.mxu0 }
 0x106   : > { %v822_v31 = vpop.f32.mrf.mxu1  ;;  %v779_v24 = vpop.f32.mrf.mxu0 }
 0x107   : > { %v780_v9 = vadd.f32 %v779_v24, %v577_v25  ;;  %v823_v10 = vadd.f32 %v822_v31, %v620_v23 }
 0x108   : > { %v824_v32 = vpop.f32.mrf.mxu1  ;;  %v781_v33 = vpop.f32.mrf.mxu0 }
 0x109   : > { %v782_v13 = vadd.f32 %v781_v33, %v579_v27  ;;  %v825_v14 = vadd.f32 %v824_v32, %v622_v26 }
 0x10a   : > { %v826_v34 = vpop.f32.mrf.mxu1  ;;  %v783_v35 = vpop.f32.mrf.mxu0 }
 0x10b   : > { %v784_v57 = vadd.f32 %v783_v35, %v581_v29  ;;  %v827_v45 = vadd.f32 %v826_v34, %v624_v28 }
 0x10c   : > { %v828_v36 = vpop.f32.mrf.mxu1  ;;  %v785_v37 = vpop.f32.mrf.mxu0 }
 0x10d   : > { %v786_v7 = vadd.f32 %v785_v37, %v583_v22  ;;  %v829_v1 = vadd.f32 %v828_v36, %v626_v30 }
 0x11a   : > { %v1029_v38 = vpop.f32.mrf.mxu1  ;;  %v986_v39 = vpop.f32.mrf.mxu0 }
 0x11c   : > { %v1031_v40 = vpop.f32.mrf.mxu1  ;;  %v988_v41 = vpop.f32.mrf.mxu0 }
 0x11e   : > { %v1033_v43 = vpop.f32.mrf.mxu1  ;;  %v990_v44 = vpop.f32.mrf.mxu0 }
 0x120   : > { %v2814_v47 = vpop.f32.mrf.mxu1  ;;  %v992_v48 = vpop.f32.mrf.mxu0 }
 0x12e   : > { %v1174_v49 = vpop.f32.mrf.mxu0  ;;  %v1217_v50 = vpop.f32.mrf.mxu1 }
 0x12f   : > { %v1175_v0 = vadd.f32 %v1174_v49, %v986_v39  ;;  %v1218_v19 = vadd.f32 %v1217_v50, %v1029_v38 }
 0x130   : > { %v1176_v51 = vpop.f32.mrf.mxu0  ;;  %v1219_v52 = vpop.f32.mrf.mxu1 }
 0x131   : > { %v1177_v23 = vadd.f32 %v1176_v51, %v988_v41  ;;  %v1220_v31 = vadd.f32 %v1219_v52, %v1031_v40 }
 0x132   : > { %v1178_v53 = vpop.f32.mrf.mxu0  ;;  %v1221_v54 = vpop.f32.mrf.mxu1 }
 0x133   : > { %v1179_v27 = vadd.f32 %v1178_v53, %v990_v44  ;;  %v1222_v26 = vadd.f32 %v1221_v54, %v1033_v43 }
 0x134   : > { %v1180_v55 = vpop.f32.mrf.mxu0  ;;  %v1223_v56 = vpop.f32.mrf.mxu1 }
 0x135   : > { %v1181_v22 = vadd.f32 %v1180_v55, %v992_v48  ;;  %v1224_v30 = vadd.f32 %v1223_v56, %v2814_v47  ;;  %v3031_v55 = vld [vmem:[#allocation5_spill] sm:$0xff] }
 0x142   : > { %v1394_v58 = vpop.f32.mrf.mxu0  ;;  %v1437_v42 = vpop.f32.mrf.mxu1 }
 0x143   : > { %v1446_v20 = vadd.f32 %v1394_v58, %v780_v9  ;;  %v1448_v21 = vadd.f32 %v1437_v42, %v823_v10  ;;  %v3032_v58 = vld [vmem:[#allocation6_spill] sm:$0xff] }
 0x144   : > { %v1396_v59 = vpop.f32.mrf.mxu0  ;;  %v1439_v46 = vpop.f32.mrf.mxu1 }
 0x145   : > { %v2830_v39 = vadd.f32 %v1680_v5, %v1446_v20  ;;  %v2832_v38 = vadd.f32 %v1688_v6, %v1448_v21  ;;  %v1447_v29 = vadd.f32 %v1396_v59, %v782_v13  ;;  %v1449_v28 = vadd.f32 %v1439_v46, %v825_v14 }
 0x146   : > { %v1398_v2 = vpop.f32.mrf.mxu0  ;;  %v1441_v3 = vpop.f32.mrf.mxu1 }
 0x147   : > { %v1450_v32 = vadd.f32 %v1398_v2, %v784_v57  ;;  %v1452_v33 = vadd.f32 %v1441_v3, %v827_v45  ;;  %v1705_v48 = vmax.f32 %v2830_v39, 0.0  ;;  %v1707_v47 = vmax.f32 %v2832_v38, 0.0 }
 0x148   : > { %v1400_v15 = vpop.f32.mrf.mxu0  ;;  %v1443_v16 = vpop.f32.mrf.mxu1  ;;  %v2842_v56 = vadd.f32 %v3031_v55, %v1447_v29  ;;  %v2845_v42 = vadd.f32 %v3032_v58, %v1449_v28 }
 0x149   : > { %v1451_v40 = vadd.f32 %v1400_v15, %v786_v7  ;;  %v1453_v41 = vadd.f32 %v1443_v16, %v829_v1  ;;  %v2835_v49 = vadd.f32 %v1680_v5, %v1450_v32  ;;  %v2837_v50 = vadd.f32 %v1688_v6, %v1452_v33 }
 0x14a   : > { %v1706_v16 = vmax.f32 %v2842_v56, 0.0 }
 0x14b   : > { %v1711_v9 = vmax.f32 %v2837_v50, 0.0  ;;  %v2854_v10 = vadd.f32 %v3031_v55, %v1451_v40  ;;  %v2857_v13 = vadd.f32 %v3032_v58, %v1453_v41 }
 0x14d   : > { %v1712_v45 = vmax.f32 %v2857_v13, 0.0 }
 0x156   : > { %v1616_v8 = vpop.f32.mrf.mxu0  ;;  %v1659_v25 = vpop.f32.mrf.mxu1 }
 0x157   : > { %v1668_v24 = vadd.f32 %v1616_v8, %v1175_v0  ;;  %v1670_v61 = vadd.f32 %v1659_v25, %v1218_v19  ;;  %v1709_v8 = vmax.f32 %v2835_v49, 0.0 }
 0x158   : > { %v1618_v62 = vpop.f32.mrf.mxu0  ;;  %v1661_v63 = vpop.f32.mrf.mxu1 }
 0x159   : > { %v1734_v34 = vadd.f32 %v1717_v11, %v1668_v24  ;;  %v1669_v35 = vadd.f32 %v1618_v62, %v1177_v23  ;;  %v1736_v43 = vadd.f32 %v1725_v12, %v1670_v61  ;;  %v1671_v44 = vadd.f32 %v1661_v63, %v1220_v31 }
 0x15a   : > { %v1620_v36 = vpop.f32.mrf.mxu0  ;;  %v1663_v37 = vpop.f32.mrf.mxu1  ;;  %v1708_v23 = vmax.f32 %v2845_v42, 0.0 }
 0x15b   : > { %v1672_v51 = vadd.f32 %v1620_v36, %v1179_v27  ;;  %v1674_v52 = vadd.f32 %v1663_v37, %v1222_v26  ;;  %v2847_v59 = vmax.f32 %v1734_v34, 0.0  ;;  %v1735_v46 = vadd.f32 %v1721_v17, %v1669_v35 }
 0x15c   : > { %v1622_v53 = vpop.f32.mrf.mxu0  ;;  %v1665_v54 = vpop.f32.mrf.mxu1  ;;  %v2849_v4 = vmax.f32 %v1736_v43, 0.0  ;;  %v1737_v5 = vadd.f32 %v1729_v18, %v1671_v44 }
 0x15d   : > { %v1738_v2 = vadd.f32 %v1717_v11, %v1672_v51  ;;  %v1740_v3 = vadd.f32 %v1725_v12, %v1674_v52  ;;  %v1673_v6 = vadd.f32 %v1622_v53, %v1181_v22  ;;  %v1675_v7 = vadd.f32 %v1665_v54, %v1224_v30 }
 0x15e   : > { %v1750_v0 = vadd.f32 %v2847_v59, %v1705_v48  ;;  %v2867_v19 = vmax.f32 %v1735_v46, 0.0  ;;  %v1752_v20 = vadd.f32 %v2849_v4, %v1707_v47  ;;  %v2872_v21 = vmax.f32 %v1737_v5, 0.0 }
 0x15f   : > { %v2859_v14 = vmax.f32 %v1738_v2, 0.0  ;;  %v2861_v15 = vmax.f32 %v1740_v3, 0.0  ;;  %v1739_v11 = vadd.f32 %v1721_v17, %v1673_v6  ;;  %v1741_v12 = vadd.f32 %v1729_v18, %v1675_v7 }
 0x160   : > { %v1710_v18 = vmax.f32 %v2854_v10, 0.0  ;;  %v1751_v61 = vadd.f32 %v2867_v19, %v1706_v16  ;;  %v1753_v32 = vadd.f32 %v2872_v21, %v1708_v23 }
 0x161   : > { %v1754_v57 = vadd.f32 %v2859_v14, %v1709_v8  ;;  %v1756_v17 = vadd.f32 %v2861_v15, %v1711_v9  ;;  %v2882_v1 = vmax.f32 %v1739_v11, 0.0  ;;  %v2884_v25 = vmax.f32 %v1741_v12, 0.0 }
 0x162   : > { %v1949_v39 = vsub.f32 %v1709_v8, %v2859_v14 }
 0x163   : > { %v1758_v31 = vadd.f32 %v1754_v57, %v1750_v0  ;;  %v1772_v24 = vadd.f32 %v1756_v17, %v1752_v20  ;;  %v1755_v27 = vadd.f32 %v2882_v1, %v1710_v18  ;;  %v1757_v26 = vadd.f32 %v2884_v25, %v1712_v45 }
 0x164   : > { %v1950_v38 = vsub.f32 %v1710_v18, %v2882_v1 }
 0x165   : > { %v1759_v33 = vrot.slane %v1758_v31, 4  ;;  %v1765_v62 = vadd.f32 %v1755_v27, %v1751_v61  ;;  %v1773_v63 = vrot.slane %v1772_v24, 4  ;;  %v1779_v29 = vadd.f32 %v1757_v26, %v1753_v32 }
 0x167   : > { %v1760_v28 = vadd.f32 %v1759_v33, %v1758_v31  ;;  %v1766_v22 = vrot.slane %v1765_v62, 4  ;;  %v1780_v35 = vrot.slane %v1779_v29, 4  ;;  %v1774_v37 = vadd.f32 %v1773_v63, %v1772_v24 }
 0x169   : > { %v1761_v30 = vrot.slane %v1760_v28, 2  ;;  %v1767_v34 = vadd.f32 %v1766_v22, %v1765_v62  ;;  %v1775_v51 = vrot.slane %v1774_v37, 2  ;;  %v1781_v52 = vadd.f32 %v1780_v35, %v1779_v29 }
 0x16b   : > { %v1762_v36 = vadd.f32 %v1761_v30, %v1760_v28  ;;  %v1768_v40 = vrot.slane %v1767_v34, 2  ;;  %v1776_v55 = vadd.f32 %v1775_v51, %v1774_v37  ;;  %v1782_v58 = vrot.slane %v1781_v52, 2  ;;  %v352_v51 = vld [vmem:[%s3021_s5 + $0x8] sm:$0xff] }
 0x16d   : > { %v1763_v41 = vrot.slane %v1762_v36, 1  ;;  %v1769_v43 = vadd.f32 %v1768_v40, %v1767_v34  ;;  %v1777_v46 = vrot.slane %v1776_v55, 1  ;;  %v1783_v2 = vadd.f32 %v1782_v58, %v1781_v52  ;;  %v351_v52 = vld [vmem:[%s3021_s5] sm:$0xff] }
 0x16f   : > { %v1764_v44 = vadd.f32 %v1763_v41, %v1762_v36  ;;  %v1770_v53 = vrot.slane %v1769_v43, 1  ;;  %v1778_v3 = vadd.f32 %v1777_v46, %v1776_v55  ;;  %v1784_v5 = vrot.slane %v1783_v2, 1 }
 0x171   : > { %1795 = vrot.lane.b32.xlu1 %v1764_v44, %s2487_s14  ;;  %1787 = vrot.lane.b32.xlu0 %v1764_v44, %s2488_s15  ;;  %v1771_v54 = vadd.f32 %v1770_v53, %v1769_v43  ;;  %v1785_v6 = vadd.f32 %v1784_v5, %v1783_v2  ;;  %v354_v5 = vld [vmem:[%s3021_s5 + $0x18] sm:$0xff] }
 0x175   : > { %1801 = vrot.lane.b32.xlu1 %v1771_v54, %s2488_s15  ;;  %1791 = vrot.lane.b32.xlu0 %v1764_v44, %s2489_s16 }
 0x179   : > { %1809 = vrot.lane.b32.xlu1 %v1771_v54, %s2487_s14  ;;  %1805 = vrot.lane.b32.xlu0 %v1771_v54, %s2489_s16 }
 0x17d   : > { %1819 = vrot.lane.b32.xlu1 %v1778_v3, %s2489_s16  ;;  %1815 = vrot.lane.b32.xlu0 %v1778_v3, %s2488_s15 }
 0x181   : > { %1829 = vrot.lane.b32.xlu1 %v1785_v6, %s2488_s15  ;;  %1823 = vrot.lane.b32.xlu0 %v1778_v3, %s2487_s14 }
 0x185   : > { %1837 = vrot.lane.b32.xlu1 %v1785_v6, %s2487_s14  ;;  %1833 = vrot.lane.b32.xlu0 %v1785_v6, %s2489_s16 }
 0x1e3   : > { %v1796_v7 = vpop.permute.xlu1 %1795  ;;  %v1788_v11 = vpop.permute.xlu0 %1787 }
 0x1e4   : > { %v1790_v12 = vadd.f32 %v1788_v11, %v1764_v44 }
 0x1e7   : > { %v1792_v0 = vpop.permute.xlu0 %1791  ;;  %v1802_v57 = vpop.permute.xlu1 %1801 }
 0x1e8   : > { %v1794_v20 = vadd.f32 %v1792_v0, %v1790_v12  ;;  %v356_v12 = vld [vmem:[%s3022_s6 + $0x8] sm:$0xff]  ;;  %v355_v0 = vld [vmem:[%s3022_s6] sm:$0xff] }
 0x1ea   : > { %v1798_v17 = vadd.f32 %v1796_v7, %v1794_v20 }
 0x1eb   : > { %v1806_v24 = vpop.permute.xlu0 %1805  ;;  %v1810_v27 = vpop.permute.xlu1 %1809 }
 0x1ec   : > { %v1799_v31 = vadd.f32 %v1798_v17, %v1771_v54  ;;  %v353_v54 = vld [vmem:[%s3021_s5 + $0x10] sm:$0xff] }
 0x1ee   : > { %v1804_v61 = vadd.f32 %v1802_v57, %v1799_v31 }
 0x1ef   : > { %v1816_v33 = vpop.permute.xlu0 %1815  ;;  %v1820_v63 = vpop.permute.xlu1 %1819 }
 0x1f0   : > { %v1808_v26 = vadd.f32 %v1806_v24, %v1804_v61  ;;  %v357_v24 = vld [vmem:[%s3022_s6 + $0x10] sm:$0xff] }
 0x1f2   : > { %v1812_v32 = vadd.f32 %v1810_v27, %v1808_v26 }
 0x1f3   : > { %v1824_v22 = vpop.permute.xlu0 %1823  ;;  %v1830_v34 = vpop.permute.xlu1 %1829 }
 0x1f4   : > { %v1813_v62 = vadd.f32 %v1812_v32, %v1778_v3 }
 0x1f6   : > { %v1818_v29 = vadd.f32 %v1816_v33, %v1813_v62  ;;  %v358_v33 = vld [vmem:[%s3022_s6 + $0x18] sm:$0xff] }
 0x1f7   : > { %v1834_v37 = vpop.permute.xlu0 %1833  ;;  %v1838_v41 = vpop.permute.xlu1 %1837 }
 0x1f8   : > { %v1822_v28 = vadd.f32 %v1820_v63, %v1818_v29 }
 0x1fa   : > { %v1826_v30 = vadd.f32 %v1824_v22, %v1822_v28  ;;  %v359_v22 = vld [vmem:[%s3023_s7] sm:$0xff] }
 0x1fc   : > { %v1827_v35 = vadd.f32 %v1826_v30, %v1785_v6  ;;  %v363_v30 = vld [vmem:[%s3024_s8] sm:$0xff] }
 0x1fe   : > { %v1832_v36 = vadd.f32 %v1830_v34, %v1827_v35  ;;  %v360_v34 = vld [vmem:[%s3023_s7 + $0x8] sm:$0xff] }
 0x1ff   : > { %v364_v35 = vld [vmem:[%s3024_s8 + $0x8] sm:$0xff] }
 0x200   : > { %v1836_v40 = vadd.f32 %v1834_v37, %v1832_v36 }
 0x202   : > { %v1840_v43 = vadd.f32 %v1838_v41, %v1836_v40 }
 0x204   : > { %v1841_v44 = vmul.f32 0.00390625, %v1840_v43 }
 0x206   : > { %v1845_v53 = vrot.slane %v1841_v44, %v2816_v60 }
 0x208   : > { %v1847_v55 = vmul.f32 %v1845_v53, %v352_v51  ;;  %v1846_v58 = vmul.f32 %v1845_v53, %v351_v52  ;;  %v1848_v3 = vmul.f32 %v1845_v53, %v353_v54  ;;  %v1849_v7 = vmul.f32 %v1845_v53, %v354_v5  ;;  %v361_v51 = vld [vmem:[%s3023_s7 + $0x10] sm:$0xff]  ;;  %v362_v5 = vld [vmem:[%s3023_s7 + $0x18] sm:$0xff] }
 0x209   : > { %v365_v52 = vld [vmem:[%s3024_s8 + $0x10] sm:$0xff] }
 0x20a   : > { %v1854_v46 = vsel %vm1850_vm5, %v1847_v55, 0.0  ;;  %v1851_v2 = vsel %vm1850_vm5, %v1846_v58, 0.0  ;;  %v1857_v6 = vsel %vm1850_vm5, %v1848_v3, 0.0  ;;  %v1860_v11 = vsel %vm1850_vm5, %v1849_v7, 0.0 }
 0x20b   : > { %1855 = vadd.xlane.f32.xlu1 %v1854_v46  ;;  %1852 = vadd.xlane.f32.xlu0 %v1851_v2 }
 0x20f   : > { %1858 = vadd.xlane.f32.xlu0 %v1857_v6  ;;  %v366_v6 = vld [vmem:[%s3024_s8 + $0x18] sm:$0xff] }
 0x213   : > { %1861 = vadd.xlane.f32.xlu0 %v1860_v11 }
 0x294   : > { %v1856_v20 = vpop.xlane.xlu1 %1855  ;;  %v1853_v57 = vpop.xlane.xlu0 %1852 }
 0x295   : > { %v1864_v17 = vadd.f32 %v1856_v20, %v356_v12  ;;  %v1863_v31 = vadd.f32 %v1853_v57, %v355_v0 }
 0x297   : > { %v1868_v61 = vmax.f32 %v1864_v17, 0.0  ;;  %v1867_v27 = vmax.f32 %v1863_v31, 0.0 }
 0x298   : > { %v1859_v26 = vpop.xlane.xlu0 %1858 }
 0x299   : > { %v1865_v32 = vadd.f32 %v1859_v26, %v357_v24  ;;  %1878 = vperm.xlu0 %2260, %v1868_v61   ;;  %1873 = vperm.xlu1 %2259, %v1867_v27  }
 0x29b   : > { %v1869_v62 = vmax.f32 %v1865_v32, 0.0 }
 0x29c   : > { %v1862_v63 = vpop.xlane.xlu0 %1861 }
 0x29d   : > { %v1866_v29 = vadd.f32 %v1862_v63, %v358_v33  ;;  %1883 = vperm.xlu1 %2259, %v1869_v62  }
 0x29f   : > { %v1870_v28 = vmax.f32 %v1866_v29, 0.0 }
 0x2a1   : > { %1888 = vperm.xlu1 %2259, %v1870_v28  }
 0x314   : > { %v1874_v36 = vpop.permute.xlu1 %1873  ;;  %v1879_v37 = vpop.permute.xlu0 %1878 }
 0x315   : > { %v1891_v40 = vmul.f32 %v1874_v36, %v359_v22  ;;  %v1908_v41 = vmul.f32 %v1874_v36, %v363_v30  ;;  %v1892_v43 = vmul.f32 %v1879_v37, %v360_v34  ;;  %v1909_v44 = vmul.f32 %v1879_v37, %v364_v35 }
 0x317   : > { %v1895_v53 = vsel %vm1850_vm5, %v1891_v40, 0.0  ;;  %v1912_v54 = vsel %vm1850_vm5, %v1908_v41, 0.0  ;;  %v1896_v58 = vsel %vm1850_vm5, %v1892_v43, 0.0  ;;  %v1913_v46 = vsel %vm1850_vm5, %v1909_v44, 0.0 }
 0x318   : > { %v1884_v55 = vpop.permute.xlu1 %1883  ;;  %v1897_v12 = vadd.f32 %v1896_v58, %v1895_v53  ;;  %v1914_v0 = vadd.f32 %v1913_v46, %v1912_v54 }
 0x319   : > { %v1893_v2 = vmul.f32 %v1884_v55, %v361_v51  ;;  %v1910_v3 = vmul.f32 %v1884_v55, %v365_v52 }
 0x31b   : > { %v1898_v7 = vsel %vm1850_vm5, %v1893_v2, 0.0  ;;  %v1915_v11 = vsel %vm1850_vm5, %v1910_v3, 0.0  ;;  %v1945_v2 = vsub.f32 %v1705_v48, %v2847_v59  ;;  %v1951_v48 = vsub.f32 %v1711_v9, %v2861_v15 }
 0x31c   : > { %v1889_v20 = vpop.permute.xlu1 %1888  ;;  %v1899_v31 = vadd.f32 %v1898_v7, %v1897_v12  ;;  %v1916_v24 = vadd.f32 %v1915_v11, %v1914_v0  ;;  %v1948_v7 = vsub.f32 %v1708_v23, %v2872_v21 }
 0x31d   : > { %v1894_v57 = vmul.f32 %v1889_v20, %v362_v5  ;;  %v1911_v17 = vmul.f32 %v1889_v20, %v366_v6  ;;  %v1947_v5 = vsub.f32 %v1707_v47, %v2849_v4  ;;  %v1946_v6 = vsub.f32 %v1706_v16, %v2867_v19 }
 0x31e   : > { %v1952_v47 = vsub.f32 %v1712_v45, %v2884_v25 }
 0x31f   : > { %v1900_v61 = vsel %vm1850_vm5, %v1894_v57, 0.0  ;;  %v1917_v27 = vsel %vm1850_vm5, %v1911_v17, 0.0 }
 0x320   : > { %v1901_v26 = vadd.f32 %v1900_v61, %v1899_v31  ;;  %v1918_v32 = vadd.f32 %v1917_v27, %v1916_v24 }
 0x322   : > { %v1902_v33 = vrot.slane %v1901_v26, 4  ;;  %v1919_v62 = vrot.slane %v1918_v32, 4 }
 0x324   : > { %v1903_v63 = vadd.f32 %v1902_v33, %v1901_v26  ;;  %v1920_v29 = vadd.f32 %v1919_v62, %v1918_v32 }
 0x326   : > { %v1904_v28 = vrot.slane %v1903_v63, 2  ;;  %v1921_v22 = vrot.slane %v1920_v29, 2 }
 0x328   : > { %v1905_v30 = vadd.f32 %v1904_v28, %v1903_v63  ;;  %v1922_v34 = vadd.f32 %v1921_v22, %v1920_v29 }
 0x32a   : > { %v1906_v35 = vrot.slane %v1905_v30, 1  ;;  %v1923_v36 = vrot.slane %v1922_v34, 1 }
 0x32c   : > { %v1907_v37 = vadd.f32 %v1906_v35, %v1905_v30  ;;  %v1924_v40 = vadd.f32 %v1923_v36, %v1922_v34 }
 0x32e   : > { %v1925_v41 = vsub.f32 %v1924_v40, %v1907_v37 }
 0x330   : > { %v1926_v43 = vmul.f32 1.442695, %v1925_v41 }
 0x332   : > { %2441 = vpow2.f32 %v1926_v43 }
 0x33f   : > { %v2442_v44 = vpop.eup %2441 }
 0x340   : > { %v1928_v51 = vadd.f32 1.0, %v2442_v44 }
 0x342   : > { %2443 = vrcp.f32 %v1928_v51 }
 0x34f   : > { %v2444_v52 = vpop.eup %2443 }
 0x350   : > { %1931 = vrot.lane.b32.xlu1 %v2444_v52, %s2487_s14 }
 0x354   : > { %1934 = vrot.lane.b32.xlu1 %v2444_v52, %s2489_s16 }
 0x358   : > { %1937 = vrot.lane.b32.xlu1 %v2444_v52, %s2488_s15  ;;  %s347_s15 = scalar_lea.vmem %s3025_s9, %s2232_s17 }
 0x3c2   : > { %v1932_v53 = vpop.permute.xlu1 %1931 }
 0x3c3   : > { %v1940_v55 = vsel %vm1850_vm5, %v2444_v52, %v1932_v53 }
 0x3c6   : > { %v1935_v54 = vpop.permute.xlu1 %1934 }
 0x3c7   : > { %v1942_v58 = vsel %vm1941_vm6, %v1940_v55, %v1935_v54 }
 0x3ca   : > { %v1938_v46 = vpop.permute.xlu1 %1937 }
 0x3cb   : > { %v1944_v3 = vsel %vm1943_vm7, %v1942_v58, %v1938_v46 }
 0x3cc   : > { %v1956_v11 = vrot.slane %v1944_v3, %v2816_v60 }
 0x3ce   : > { %v1957_v56 = vmul.f32 %v1956_v11, %v1945_v2  ;;  %v1958_v42 = vmul.f32 %v1956_v11, %v1946_v6  ;;  %v1959_v16 = vmul.f32 %v1956_v11, %v1947_v5  ;;  %v1960_v60 = vmul.f32 %v1956_v11, %v1948_v7 }
 0x3cf   : > { %v1961_v49 = vmul.f32 %v1956_v11, %v1949_v39  ;;  %v1962_v8 = vmul.f32 %v1956_v11, %v1950_v38  ;;  %v1963_v50 = vmul.f32 %v1956_v11, %v1951_v48  ;;  %v1964_v9 = vmul.f32 %v1956_v11, %v1952_v47 }
 0x3d0   : > { %v1965_v23 = vadd.f32 %v1957_v56, %v2847_v59  ;;  %v1966_v10 = vadd.f32 %v1958_v42, %v2867_v19  ;;  %v1967_v18 = vadd.f32 %v1959_v16, %v2849_v4  ;;  %v1968_v13 = vadd.f32 %v1960_v60, %v2872_v21 }
 0x3d1   : > { %v1969_v45 = vadd.f32 %v1961_v49, %v2859_v14  ;;  %v1970_v12 = vadd.f32 %v1962_v8, %v2882_v1  ;;  %v1971_v0 = vadd.f32 %v1963_v50, %v2861_v15  ;;  %v1972_v20 = vadd.f32 %v1964_v9, %v2884_v25 }
 0x3d2   : > { %1973 = vst [vmem:[%s347_s15] sm:$0xff] %v1965_v23  ;;  %1974 = vst [vmem:[%s347_s15 + $0x8] sm:$0xff] %v1966_v10 }
 0x3d3   : > { %1975 = vst [vmem:[%s347_s15 + $0x10] sm:$0xff] %v1967_v18  ;;  %1976 = vst [vmem:[%s347_s15 + $0x18] sm:$0xff] %v1968_v13 }
 0x3d4   : > { %1977 = vst [vmem:[%s347_s15 + $0x20] sm:$0xff] %v1969_v45  ;;  %1978 = vst [vmem:[%s347_s15 + $0x28] sm:$0xff] %v1970_v12 }
 0x3d5   : > { %1979 = vst [vmem:[%s347_s15 + $0x30] sm:$0xff] %v1971_v0  ;;  %1980 = vst [vmem:[%s347_s15 + $0x38] sm:$0xff] %v1972_v20 }
 0x3d6 PF: > { %s20_s30 = sadd.s32 1, %s2481_s30  }
 0x3d7   : > { %p17_p1 = scmp.ge.s32.totalorder %s20_s30, 4  }
 0x3d9   :  { %19 = sbr.rel (!%p17_p1) target bundleno = 1 (0x1), region = 95 }
 0x3de   :  { %2002 = vsyncpa [#allocation3], 1 }
 0x3df   :  { %2004 = vsyncpa [#allocation3 + $0x1], 1 }

</bundles_post_ra>
